<compile_context>
chip_gen: v5e
topology: v5e:2x2
jax: 0.10.0
libtpu: 0.0.40
codegen_flags: <defaults>
</compile_context>

<pallas_src>
import functools

import jax
import jax.numpy as jnp
from jax import lax
from jax.experimental import pallas as pl
from jax.experimental.pallas import tpu as pltpu


def _round_up(x, m):
    return ((x + m - 1) // m) * m


def _lstm_recurrence_kernel(gx_ref, whh_ref, h_out_ref, h_sc, c_sc, *, hidden_pad, t_blk):
    """One grid step == a block of `t_blk` timesteps of the LSTM recurrence.

    gx_ref   : (t_blk, Bp, 4*Hp)  precomputed X @ W_ih^T + (b_ih + b_hh), per-gate blocks
                                  laid out at lane offsets k*Hp (k = i, f, g, o)
    whh_ref  : (Hp, 4*Hp)         W_hh^T, per-gate blocks at lane offsets k*Hp
    h_out_ref: (t_blk, Bp, Hp)    hidden state h_t for every timestep in this block
    h_sc,c_sc: (Bp, Hp)           recurrent state, persists across the sequential grid
    """
    s = pl.program_id(0)

    # NOTE: the time axis MUST stay "arbitrary" (strictly sequential on one core):
    # h_sc / c_sc carry the recurrence across grid steps. Do not mark it "parallel".
    @pl.when(s == 0)
    def _():
        h_sc[...] = jnp.zeros_like(h_sc)
        c_sc[...] = jnp.zeros_like(c_sc)

    Hp = hidden_pad
    whh = whh_ref[...]  # hoisted: loaded once per grid step, reused for all t_blk steps

    def step(t, carry):
        h, c = carry
        # Serial part of the step: a single (Bp, Hp) @ (Hp, 4*Hp) MXU dot, f32 accumulate.
        gates = gx_ref[t] + jnp.dot(
            h.astype(whh.dtype), whh, preferred_element_type=jnp.float32
        )  # (Bp, 4*Hp)

        # Gate slices are at lane offsets 0, Hp, 2*Hp, 3*Hp -> multiples of 128 (aligned).
        i_g = jax.nn.sigmoid(gates[:, 0 * Hp:1 * Hp])
        f_g = jax.nn.sigmoid(gates[:, 1 * Hp:2 * Hp])
        g_g = jnp.tanh(gates[:, 2 * Hp:3 * Hp])
        o_g = jax.nn.sigmoid(gates[:, 3 * Hp:4 * Hp])

        c_new = f_g * c + i_g * g_g
        h_new = o_g * jnp.tanh(c_new)

        h_out_ref[t] = h_new.astype(h_out_ref.dtype)  # lane-dense (last dim = Hp = k*128)
        return h_new, c_new

    h, c = lax.fori_loop(0, t_blk, step, (h_sc[...], c_sc[...]), unroll=True)
    h_sc[...] = h
    c_sc[...] = c


def single_rnn_forward(x, w_ih, w_hh, b_ih, b_hh, w_proj, b_proj,
                       *, t_blk=16, matmul_dtype=jnp.float32,
                       vmem_limit_bytes=64 * 1024 * 1024):
    """x: (batch, seq_len, input_size) float32. Returns same shape.

    matmul_dtype=jnp.bfloat16 casts weights / matmul inputs to bf16 (f32 accumulate,
    f32 gate math) — recommended on v6e/v5e for MXU throughput & VMEM footprint.
    """
    f32 = jnp.float32
    B, S, I = x.shape
    H = w_hh.shape[1]

    Bp = _round_up(B, 8)                    # full sublanes
    Hp = _round_up(max(H, 128), 128)        # lane-aligned gate blocks, lane-dense h output
    t_blk = max(1, min(t_blk, S))           # timesteps per grid step
    Sp = pl.cdiv(S, t_blk) * t_blk
    n_blocks = Sp // t_blk

    # Per-gate weight views (PyTorch nn.LSTM gate order: i, f, g, o).
    w_ih_g = w_ih.reshape(4, H, I)
    w_hh_g = w_hh.reshape(4, H, H)
    b_g = (b_ih + b_hh).reshape(4, 1, 1, H).astype(f32)

    # --- Hoisted input matmul for the whole sequence (transpose fused into the einsum). ---
    # gx[g, s, b, h] = sum_i x[b, s, i] * w_ih[g*H + h, i]  + (b_ih + b_hh)[g*H + h]
    gx = jnp.einsum(
        'bsi,ghi->gsbh',
        x.astype(matmul_dtype), w_ih_g.astype(matmul_dtype),
        preferred_element_type=f32,
    ) + b_g                                                   # (4, S, B, H) f32

    # Pack per-gate slabs at lane offsets k*Hp; pad time/batch/hidden with zeros.
    # Padded lanes/rows/steps provably stay zero through the recurrence.
    gates_x = jnp.zeros((Sp, Bp, 4 * Hp), f32)
    for k in range(4):
        gates_x = gates_x.at[:S, :B, k * Hp:k * Hp + H].set(gx[k])

    # W_hh^T, per-gate, zero-padded to (Hp, 4*Hp).
    whh_t = jnp.zeros((Hp, 4 * Hp), matmul_dtype)
    for k in range(4):
        whh_t = whh_t.at[:H, k * Hp:k * Hp + H].set(
            jnp.transpose(w_hh_g[k]).astype(matmul_dtype))

    kernel = functools.partial(_lstm_recurrence_kernel, hidden_pad=Hp, t_blk=t_blk)

    # TODO(synk): for v7x at production sizes, single-buffer the constant-index weight spec
    #             (pipeline_mode=pl.Buffered(1)) and add a "parallel" batch-tile grid axis
    #             to use both TensorCores; omitted here (B=2 toy, 1 TC on v5e/v6e).
    h_seq = pl.pallas_call(
        kernel,
        out_shape=jax.ShapeDtypeStruct((Sp, Bp, Hp), f32),
        grid_spec=pltpu.PrefetchScalarGridSpec(
            num_scalar_prefetch=0,
            grid=(n_blocks,),
            in_specs=[
                pl.BlockSpec((t_blk, Bp, 4 * Hp), lambda s: (s, 0, 0)),  # gates_x block
                pl.BlockSpec((Hp, 4 * Hp), lambda s: (0, 0)),            # W_hh^T (resident)
            ],
            out_specs=pl.BlockSpec((t_blk, Bp, Hp), lambda s: (s, 0, 0)),
            scratch_shapes=[
                pltpu.VMEM((Bp, Hp), f32),   # h state (carried across grid steps)
                pltpu.VMEM((Bp, Hp), f32),   # c state
            ],
        ),
        compiler_params=pltpu.CompilerParams(
            dimension_semantics=("arbitrary",),    # sequential recurrence — keep arbitrary
            vmem_limit_bytes=vmem_limit_bytes,
        ),
    )(gates_x, whh_t)

    # --- Hoisted output projection for the whole sequence (transpose fused). ---
    h_valid = h_seq[:S, :B, :H]                               # (S, B, H)
    out = jnp.einsum(
        'sbh,ih->bsi',
        h_valid.astype(matmul_dtype), w_proj.astype(matmul_dtype),
        preferred_element_type=f32,
    ) + b_proj.astype(f32)
    return out.astype(x.dtype)


def _reference_forward(x, w_ih, w_hh, b_ih, b_hh, w_proj, b_proj):
    """Pure-JAX reference (lax.scan) matching torch.nn.LSTM(batch_first=True) + Linear."""
    B, S, I = x.shape
    H = w_hh.shape[1]
    b = b_ih + b_hh

    def step(carry, x_t):
        h, c = carry
        gates = x_t @ w_ih.T + h @ w_hh.T + b
        i_g = jax.nn.sigmoid(gates[:, 0 * H:1 * H])
        f_g = jax.nn.sigmoid(gates[:, 1 * H:2 * H])
        g_g = jnp.tanh(gates[:, 2 * H:3 * H])
        o_g = jax.nn.sigmoid(gates[:, 3 * H:4 * H])
        c_new = f_g * c + i_g * g_g
        h_new = o_g * jnp.tanh(c_new)
        return (h_new, c_new), h_new

    h0 = jnp.zeros((B, H), jnp.float32)
    c0 = jnp.zeros((B, H), jnp.float32)
    _, hs = lax.scan(step, (h0, c0), jnp.transpose(x, (1, 0, 2)))   # (S, B, H)
    rnn_out = jnp.transpose(hs, (1, 0, 2))                          # (B, S, H)
    proj = rnn_out.reshape(-1, H) @ w_proj.T + b_proj
    return proj.reshape(x.shape)


if __name__ == "__main__":
    # Small shapes consistent with the module: (batch, seq_len, input_size)
    batch, seq_len, input_size, hidden_size = 2, 8, 16, 32

    key = jax.random.PRNGKey(0)
    k = jax.random.split(key, 7)
    scale = 0.1
    x = jax.random.normal(k[0], (batch, seq_len, input_size), jnp.float32)
    w_ih = scale * jax.random.normal(k[1], (4 * hidden_size, input_size), jnp.float32)
    w_hh = scale * jax.random.normal(k[2], (4 * hidden_size, hidden_size), jnp.float32)
    b_ih = scale * jax.random.normal(k[3], (4 * hidden_size,), jnp.float32)
    b_hh = scale * jax.random.normal(k[4], (4 * hidden_size,), jnp.float32)
    w_proj = scale * jax.random.normal(k[5], (input_size, hidden_size), jnp.float32)
    b_proj = scale * jax.random.normal(k[6], (input_size,), jnp.float32)

    out = single_rnn_forward(x, w_ih, w_hh, b_ih, b_hh, w_proj, b_proj)
    out = jax.block_until_ready(out)

    ref = _reference_forward(x, w_ih, w_hh, b_ih, b_hh, w_proj, b_proj)
    assert out.shape == x.shape
    assert jnp.allclose(out, ref, atol=1e-4, rtol=1e-4), "mismatch vs JAX reference"

    # TODO(synk): dropout is a no-op (num_layers=1 => PyTorch LSTM ignores dropout);
    #             bidirectional=False path only; rnn_type fixed to 'LSTM'.
    print("KERNEL_OK")
</pallas_src>

<mosaic_0001>
module attributes {stable_mosaic.version = 11 : i64} {
  func.func @_lstm_recurrence_kernel(%arg0: i32, %arg1: memref<8x8x512xf32, #tpu.memory_space<vmem>>, %arg2: memref<128x512xf32, #tpu.memory_space<vmem>>, %arg3: memref<8x8x128xf32, #tpu.memory_space<vmem>>, %arg4: memref<8x128xf32, #tpu.memory_space<vmem>>, %arg5: memref<8x128xf32, #tpu.memory_space<vmem>>) attributes {dimension_semantics = [#tpu.dimension_semantics<arbitrary>], iteration_bounds = array<i64: 1>, scalar_prefetch = 0 : i64, scratch_operands = 2 : i64, tpu.core_type = #tpu.core_type<tc>, window_params = [{transform_indices = @transform_0, window_bounds = array<i64: 8, 8, 512>}, {pipeline_mode = #tpu.pipeline_mode<synchronous>, transform_indices = @transform_1, window_bounds = array<i64: 128, 512>}, {transform_indices = @transform_2, window_bounds = array<i64: 8, 8, 128>}]} {
    %c0_i32 = arith.constant 0 : i32
    %0 = arith.cmpi eq, %arg0, %c0_i32 : i32
    %1 = arith.extui %0 : i1 to i32
    %c0_i32_0 = arith.constant 0 : i32
    %2 = arith.cmpi ne, %1, %c0_i32_0 : i32
    scf.if %2 {
      %cst_74 = arith.constant 0.000000e+00 : f32
      %280 = vector.broadcast %cst_74 : f32 to vector<8x128xf32>
      %c0_75 = arith.constant 0 : index
      %c0_76 = arith.constant 0 : index
      %281 = vector.load %arg4[%c0_75, %c0_76] : memref<8x128xf32, #tpu.memory_space<vmem>>, vector<8x128xf32>
      tpu.vector_store %arg4[%c0_75, %c0_76], %280 {strides = array<i32>} : memref<8x128xf32, #tpu.memory_space<vmem>>, vector<8x128xf32>,
      %cst_77 = arith.constant 0.000000e+00 : f32
      %282 = vector.broadcast %cst_77 : f32 to vector<8x128xf32>
      %c0_78 = arith.constant 0 : index
      %c0_79 = arith.constant 0 : index
      %283 = vector.load %arg5[%c0_78, %c0_79] : memref<8x128xf32, #tpu.memory_space<vmem>>, vector<8x128xf32>
      tpu.vector_store %arg5[%c0_78, %c0_79], %282 {strides = array<i32>} : memref<8x128xf32, #tpu.memory_space<vmem>>, vector<8x128xf32>,
    } else {
    }
    %c0 = arith.constant 0 : index
    %c0_1 = arith.constant 0 : index
    %3 = vector.load %arg2[%c0, %c0_1] : memref<128x512xf32, #tpu.memory_space<vmem>>, vector<128x512xf32>
    %c0_2 = arith.constant 0 : index
    %c0_3 = arith.constant 0 : index
    %4 = vector.load %arg4[%c0_2, %c0_3] : memref<8x128xf32, #tpu.memory_space<vmem>>, vector<8x128xf32>
    %c0_4 = arith.constant 0 : index
    %c0_5 = arith.constant 0 : index
    %5 = vector.load %arg5[%c0_4, %c0_5] : memref<8x128xf32, #tpu.memory_space<vmem>>, vector<8x128xf32>
    %c0_i32_6 = arith.constant 0 : i32
    %6 = arith.index_cast %c0_i32_6 : i32 to index
    %c0_7 = arith.constant 0 : index
    %c0_8 = arith.constant 0 : index
    %7 = vector.load %arg1[%6, %c0_7, %c0_8] : memref<8x8x512xf32, #tpu.memory_space<vmem>>, vector<1x8x512xf32>
    %8 = vector.shape_cast %7 : vector<1x8x512xf32> to vector<8x512xf32>
    %cst = arith.constant dense<0.000000e+00> : vector<8x512xf32>
    %9 = tpu.matmul %4, %3, %cst {dimension_numbers = #tpu.dot_dimension_numbers<[1], [0], [0], [1], [0, 0, 1, 1], [], []>} : vector<8x128xf32>, vector<128x512xf32>, vector<8x512xf32> -> vector<8x512xf32>
    %10 = arith.addf %8, %9 : vector<8x512xf32>
    %11 = vector.extract_strided_slice %10 {offsets = [0, 0], sizes = [8, 128], strides = [1, 1]} : vector<8x512xf32> to vector<8x128xf32>
    %12 = arith.negf %11 : vector<8x128xf32>
    %13 = math.exp %12 : vector<8x128xf32>
    %cst_9 = arith.constant 1.000000e+00 : f32
    %14 = vector.broadcast %cst_9 : f32 to vector<8x128xf32>
    %15 = arith.addf %14, %13 : vector<8x128xf32>
    %16 = arith.divf %14, %15 : vector<8x128xf32>
    %17 = vector.extract_strided_slice %10 {offsets = [0, 128], sizes = [8, 128], strides = [1, 1]} : vector<8x512xf32> to vector<8x128xf32>
    %18 = arith.negf %17 : vector<8x128xf32>
    %19 = math.exp %18 : vector<8x128xf32>
    %cst_10 = arith.constant 1.000000e+00 : f32
    %20 = vector.broadcast %cst_10 : f32 to vector<8x128xf32>
    %21 = arith.addf %20, %19 : vector<8x128xf32>
    %22 = arith.divf %20, %21 : vector<8x128xf32>
    %23 = vector.extract_strided_slice %10 {offsets = [0, 256], sizes = [8, 128], strides = [1, 1]} : vector<8x512xf32> to vector<8x128xf32>
    %24 = math.tanh %23 : vector<8x128xf32>
    %25 = vector.extract_strided_slice %10 {offsets = [0, 384], sizes = [8, 128], strides = [1, 1]} : vector<8x512xf32> to vector<8x128xf32>
    %26 = arith.negf %25 : vector<8x128xf32>
    %27 = math.exp %26 : vector<8x128xf32>
    %cst_11 = arith.constant 1.000000e+00 : f32
    %28 = vector.broadcast %cst_11 : f32 to vector<8x128xf32>
    %29 = arith.addf %28, %27 : vector<8x128xf32>
    %30 = arith.divf %28, %29 : vector<8x128xf32>
    %31 = arith.mulf %22, %5 : vector<8x128xf32>
    %32 = arith.mulf %16, %24 : vector<8x128xf32>
    %33 = arith.addf %31, %32 : vector<8x128xf32>
    %34 = math.tanh %33 : vector<8x128xf32>
    %35 = arith.mulf %30, %34 : vector<8x128xf32>
    %36 = arith.index_cast %c0_i32_6 : i32 to index
    %c0_12 = arith.constant 0 : index
    %c0_13 = arith.constant 0 : index
    %37 = vector.load %arg3[%36, %c0_12, %c0_13] : memref<8x8x128xf32, #tpu.memory_space<vmem>>, vector<1x8x128xf32>
    %38 = vector.shape_cast %37 : vector<1x8x128xf32> to vector<8x128xf32>
    %39 = vector.shape_cast %35 : vector<8x128xf32> to vector<1x8x128xf32>
    tpu.vector_store %arg3[%36, %c0_12, %c0_13], %39 {strides = array<i32>} : memref<8x8x128xf32, #tpu.memory_space<vmem>>, vector<1x8x128xf32>,
    %c1_i32 = arith.constant 1 : i32
    %40 = arith.index_cast %c1_i32 : i32 to index
    %c0_14 = arith.constant 0 : index
    %c0_15 = arith.constant 0 : index
    %41 = vector.load %arg1[%40, %c0_14, %c0_15] : memref<8x8x512xf32, #tpu.memory_space<vmem>>, vector<1x8x512xf32>
    %42 = vector.shape_cast %41 : vector<1x8x512xf32> to vector<8x512xf32>
    %cst_16 = arith.constant dense<0.000000e+00> : vector<8x512xf32>
    %43 = tpu.matmul %35, %3, %cst_16 {dimension_numbers = #tpu.dot_dimension_numbers<[1], [0], [0], [1], [0, 0, 1, 1], [], []>} : vector<8x128xf32>, vector<128x512xf32>, vector<8x512xf32> -> vector<8x512xf32>
    %44 = arith.addf %42, %43 : vector<8x512xf32>
    %45 = vector.extract_strided_slice %44 {offsets = [0, 0], sizes = [8, 128], strides = [1, 1]} : vector<8x512xf32> to vector<8x128xf32>
    %46 = arith.negf %45 : vector<8x128xf32>
    %47 = math.exp %46 : vector<8x128xf32>
    %cst_17 = arith.constant 1.000000e+00 : f32
    %48 = vector.broadcast %cst_17 : f32 to vector<8x128xf32>
    %49 = arith.addf %48, %47 : vector<8x128xf32>
    %50 = arith.divf %48, %49 : vector<8x128xf32>
    %51 = vector.extract_strided_slice %44 {offsets = [0, 128], sizes = [8, 128], strides = [1, 1]} : vector<8x512xf32> to vector<8x128xf32>
    %52 = arith.negf %51 : vector<8x128xf32>
    %53 = math.exp %52 : vector<8x128xf32>
    %cst_18 = arith.constant 1.000000e+00 : f32
    %54 = vector.broadcast %cst_18 : f32 to vector<8x128xf32>
    %55 = arith.addf %54, %53 : vector<8x128xf32>
    %56 = arith.divf %54, %55 : vector<8x128xf32>
    %57 = vector.extract_strided_slice %44 {offsets = [0, 256], sizes = [8, 128], strides = [1, 1]} : vector<8x512xf32> to vector<8x128xf32>
    %58 = math.tanh %57 : vector<8x128xf32>
    %59 = vector.extract_strided_slice %44 {offsets = [0, 384], sizes = [8, 128], strides = [1, 1]} : vector<8x512xf32> to vector<8x128xf32>
    %60 = arith.negf %59 : vector<8x128xf32>
    %61 = math.exp %60 : vector<8x128xf32>
    %cst_19 = arith.constant 1.000000e+00 : f32
    %62 = vector.broadcast %cst_19 : f32 to vector<8x128xf32>
    %63 = arith.addf %62, %61 : vector<8x128xf32>
    %64 = arith.divf %62, %63 : vector<8x128xf32>
    %65 = arith.mulf %56, %33 : vector<8x128xf32>
    %66 = arith.mulf %50, %58 : vector<8x128xf32>
    %67 = arith.addf %65, %66 : vector<8x128xf32>
    %68 = math.tanh %67 : vector<8x128xf32>
    %69 = arith.mulf %64, %68 : vector<8x128xf32>
    %70 = arith.index_cast %c1_i32 : i32 to index
    %c0_20 = arith.constant 0 : index
    %c0_21 = arith.constant 0 : index
    %71 = vector.load %arg3[%70, %c0_20, %c0_21] : memref<8x8x128xf32, #tpu.memory_space<vmem>>, vector<1x8x128xf32>
    %72 = vector.shape_cast %71 : vector<1x8x128xf32> to vector<8x128xf32>
    %73 = vector.shape_cast %69 : vector<8x128xf32> to vector<1x8x128xf32>
    tpu.vector_store %arg3[%70, %c0_20, %c0_21], %73 {strides = array<i32>} : memref<8x8x128xf32, #tpu.memory_space<vmem>>, vector<1x8x128xf32>,
    %c2_i32 = arith.constant 2 : i32
    %74 = arith.index_cast %c2_i32 : i32 to index
    %c0_22 = arith.constant 0 : index
    %c0_23 = arith.constant 0 : index
    %75 = vector.load %arg1[%74, %c0_22, %c0_23] : memref<8x8x512xf32, #tpu.memory_space<vmem>>, vector<1x8x512xf32>
    %76 = vector.shape_cast %75 : vector<1x8x512xf32> to vector<8x512xf32>
    %cst_24 = arith.constant dense<0.000000e+00> : vector<8x512xf32>
    %77 = tpu.matmul %69, %3, %cst_24 {dimension_numbers = #tpu.dot_dimension_numbers<[1], [0], [0], [1], [0, 0, 1, 1], [], []>} : vector<8x128xf32>, vector<128x512xf32>, vector<8x512xf32> -> vector<8x512xf32>
    %78 = arith.addf %76, %77 : vector<8x512xf32>
    %79 = vector.extract_strided_slice %78 {offsets = [0, 0], sizes = [8, 128], strides = [1, 1]} : vector<8x512xf32> to vector<8x128xf32>
    %80 = arith.negf %79 : vector<8x128xf32>
    %81 = math.exp %80 : vector<8x128xf32>
    %cst_25 = arith.constant 1.000000e+00 : f32
    %82 = vector.broadcast %cst_25 : f32 to vector<8x128xf32>
    %83 = arith.addf %82, %81 : vector<8x128xf32>
    %84 = arith.divf %82, %83 : vector<8x128xf32>
    %85 = vector.extract_strided_slice %78 {offsets = [0, 128], sizes = [8, 128], strides = [1, 1]} : vector<8x512xf32> to vector<8x128xf32>
    %86 = arith.negf %85 : vector<8x128xf32>
    %87 = math.exp %86 : vector<8x128xf32>
    %cst_26 = arith.constant 1.000000e+00 : f32
    %88 = vector.broadcast %cst_26 : f32 to vector<8x128xf32>
    %89 = arith.addf %88, %87 : vector<8x128xf32>
    %90 = arith.divf %88, %89 : vector<8x128xf32>
    %91 = vector.extract_strided_slice %78 {offsets = [0, 256], sizes = [8, 128], strides = [1, 1]} : vector<8x512xf32> to vector<8x128xf32>
    %92 = math.tanh %91 : vector<8x128xf32>
    %93 = vector.extract_strided_slice %78 {offsets = [0, 384], sizes = [8, 128], strides = [1, 1]} : vector<8x512xf32> to vector<8x128xf32>
    %94 = arith.negf %93 : vector<8x128xf32>
    %95 = math.exp %94 : vector<8x128xf32>
    %cst_27 = arith.constant 1.000000e+00 : f32
    %96 = vector.broadcast %cst_27 : f32 to vector<8x128xf32>
    %97 = arith.addf %96, %95 : vector<8x128xf32>
    %98 = arith.divf %96, %97 : vector<8x128xf32>
    %99 = arith.mulf %90, %67 : vector<8x128xf32>
    %100 = arith.mulf %84, %92 : vector<8x128xf32>
    %101 = arith.addf %99, %100 : vector<8x128xf32>
    %102 = math.tanh %101 : vector<8x128xf32>
    %103 = arith.mulf %98, %102 : vector<8x128xf32>
    %104 = arith.index_cast %c2_i32 : i32 to index
    %c0_28 = arith.constant 0 : index
    %c0_29 = arith.constant 0 : index
    %105 = vector.load %arg3[%104, %c0_28, %c0_29] : memref<8x8x128xf32, #tpu.memory_space<vmem>>, vector<1x8x128xf32>
    %106 = vector.shape_cast %105 : vector<1x8x128xf32> to vector<8x128xf32>
    %107 = vector.shape_cast %103 : vector<8x128xf32> to vector<1x8x128xf32>
    tpu.vector_store %arg3[%104, %c0_28, %c0_29], %107 {strides = array<i32>} : memref<8x8x128xf32, #tpu.memory_space<vmem>>, vector<1x8x128xf32>,
    %c3_i32 = arith.constant 3 : i32
    %108 = arith.index_cast %c3_i32 : i32 to index
    %c0_30 = arith.constant 0 : index
    %c0_31 = arith.constant 0 : index
    %109 = vector.load %arg1[%108, %c0_30, %c0_31] : memref<8x8x512xf32, #tpu.memory_space<vmem>>, vector<1x8x512xf32>
    %110 = vector.shape_cast %109 : vector<1x8x512xf32> to vector<8x512xf32>
    %cst_32 = arith.constant dense<0.000000e+00> : vector<8x512xf32>
    %111 = tpu.matmul %103, %3, %cst_32 {dimension_numbers = #tpu.dot_dimension_numbers<[1], [0], [0], [1], [0, 0, 1, 1], [], []>} : vector<8x128xf32>, vector<128x512xf32>, vector<8x512xf32> -> vector<8x512xf32>
    %112 = arith.addf %110, %111 : vector<8x512xf32>
    %113 = vector.extract_strided_slice %112 {offsets = [0, 0], sizes = [8, 128], strides = [1, 1]} : vector<8x512xf32> to vector<8x128xf32>
    %114 = arith.negf %113 : vector<8x128xf32>
    %115 = math.exp %114 : vector<8x128xf32>
    %cst_33 = arith.constant 1.000000e+00 : f32
    %116 = vector.broadcast %cst_33 : f32 to vector<8x128xf32>
    %117 = arith.addf %116, %115 : vector<8x128xf32>
    %118 = arith.divf %116, %117 : vector<8x128xf32>
    %119 = vector.extract_strided_slice %112 {offsets = [0, 128], sizes = [8, 128], strides = [1, 1]} : vector<8x512xf32> to vector<8x128xf32>
    %120 = arith.negf %119 : vector<8x128xf32>
    %121 = math.exp %120 : vector<8x128xf32>
    %cst_34 = arith.constant 1.000000e+00 : f32
    %122 = vector.broadcast %cst_34 : f32 to vector<8x128xf32>
    %123 = arith.addf %122, %121 : vector<8x128xf32>
    %124 = arith.divf %122, %123 : vector<8x128xf32>
    %125 = vector.extract_strided_slice %112 {offsets = [0, 256], sizes = [8, 128], strides = [1, 1]} : vector<8x512xf32> to vector<8x128xf32>
    %126 = math.tanh %125 : vector<8x128xf32>
    %127 = vector.extract_strided_slice %112 {offsets = [0, 384], sizes = [8, 128], strides = [1, 1]} : vector<8x512xf32> to vector<8x128xf32>
    %128 = arith.negf %127 : vector<8x128xf32>
    %129 = math.exp %128 : vector<8x128xf32>
    %cst_35 = arith.constant 1.000000e+00 : f32
    %130 = vector.broadcast %cst_35 : f32 to vector<8x128xf32>
    %131 = arith.addf %130, %129 : vector<8x128xf32>
    %132 = arith.divf %130, %131 : vector<8x128xf32>
    %133 = arith.mulf %124, %101 : vector<8x128xf32>
    %134 = arith.mulf %118, %126 : vector<8x128xf32>
    %135 = arith.addf %133, %134 : vector<8x128xf32>
    %136 = math.tanh %135 : vector<8x128xf32>
    %137 = arith.mulf %132, %136 : vector<8x128xf32>
    %138 = arith.index_cast %c3_i32 : i32 to index
    %c0_36 = arith.constant 0 : index
    %c0_37 = arith.constant 0 : index
    %139 = vector.load %arg3[%138, %c0_36, %c0_37] : memref<8x8x128xf32, #tpu.memory_space<vmem>>, vector<1x8x128xf32>
    %140 = vector.shape_cast %139 : vector<1x8x128xf32> to vector<8x128xf32>
    %141 = vector.shape_cast %137 : vector<8x128xf32> to vector<1x8x128xf32>
    tpu.vector_store %arg3[%138, %c0_36, %c0_37], %141 {strides = array<i32>} : memref<8x8x128xf32, #tpu.memory_space<vmem>>, vector<1x8x128xf32>,
    %c4_i32 = arith.constant 4 : i32
    %142 = arith.index_cast %c4_i32 : i32 to index
    %c0_38 = arith.constant 0 : index
    %c0_39 = arith.constant 0 : index
    %143 = vector.load %arg1[%142, %c0_38, %c0_39] : memref<8x8x512xf32, #tpu.memory_space<vmem>>, vector<1x8x512xf32>
    %144 = vector.shape_cast %143 : vector<1x8x512xf32> to vector<8x512xf32>
    %cst_40 = arith.constant dense<0.000000e+00> : vector<8x512xf32>
    %145 = tpu.matmul %137, %3, %cst_40 {dimension_numbers = #tpu.dot_dimension_numbers<[1], [0], [0], [1], [0, 0, 1, 1], [], []>} : vector<8x128xf32>, vector<128x512xf32>, vector<8x512xf32> -> vector<8x512xf32>
    %146 = arith.addf %144, %145 : vector<8x512xf32>
    %147 = vector.extract_strided_slice %146 {offsets = [0, 0], sizes = [8, 128], strides = [1, 1]} : vector<8x512xf32> to vector<8x128xf32>
    %148 = arith.negf %147 : vector<8x128xf32>
    %149 = math.exp %148 : vector<8x128xf32>
    %cst_41 = arith.constant 1.000000e+00 : f32
    %150 = vector.broadcast %cst_41 : f32 to vector<8x128xf32>
    %151 = arith.addf %150, %149 : vector<8x128xf32>
    %152 = arith.divf %150, %151 : vector<8x128xf32>
    %153 = vector.extract_strided_slice %146 {offsets = [0, 128], sizes = [8, 128], strides = [1, 1]} : vector<8x512xf32> to vector<8x128xf32>
    %154 = arith.negf %153 : vector<8x128xf32>
    %155 = math.exp %154 : vector<8x128xf32>
    %cst_42 = arith.constant 1.000000e+00 : f32
    %156 = vector.broadcast %cst_42 : f32 to vector<8x128xf32>
    %157 = arith.addf %156, %155 : vector<8x128xf32>
    %158 = arith.divf %156, %157 : vector<8x128xf32>
    %159 = vector.extract_strided_slice %146 {offsets = [0, 256], sizes = [8, 128], strides = [1, 1]} : vector<8x512xf32> to vector<8x128xf32>
    %160 = math.tanh %159 : vector<8x128xf32>
    %161 = vector.extract_strided_slice %146 {offsets = [0, 384], sizes = [8, 128], strides = [1, 1]} : vector<8x512xf32> to vector<8x128xf32>
    %162 = arith.negf %161 : vector<8x128xf32>
    %163 = math.exp %162 : vector<8x128xf32>
    %cst_43 = arith.constant 1.000000e+00 : f32
    %164 = vector.broadcast %cst_43 : f32 to vector<8x128xf32>
    %165 = arith.addf %164, %163 : vector<8x128xf32>
    %166 = arith.divf %164, %165 : vector<8x128xf32>
    %167 = arith.mulf %158, %135 : vector<8x128xf32>
    %168 = arith.mulf %152, %160 : vector<8x128xf32>
    %169 = arith.addf %167, %168 : vector<8x128xf32>
    %170 = math.tanh %169 : vector<8x128xf32>
    %171 = arith.mulf %166, %170 : vector<8x128xf32>
    %172 = arith.index_cast %c4_i32 : i32 to index
    %c0_44 = arith.constant 0 : index
    %c0_45 = arith.constant 0 : index
    %173 = vector.load %arg3[%172, %c0_44, %c0_45] : memref<8x8x128xf32, #tpu.memory_space<vmem>>, vector<1x8x128xf32>
    %174 = vector.shape_cast %173 : vector<1x8x128xf32> to vector<8x128xf32>
    %175 = vector.shape_cast %171 : vector<8x128xf32> to vector<1x8x128xf32>
    tpu.vector_store %arg3[%172, %c0_44, %c0_45], %175 {strides = array<i32>} : memref<8x8x128xf32, #tpu.memory_space<vmem>>, vector<1x8x128xf32>,
    %c5_i32 = arith.constant 5 : i32
    %176 = arith.index_cast %c5_i32 : i32 to index
    %c0_46 = arith.constant 0 : index
    %c0_47 = arith.constant 0 : index
    %177 = vector.load %arg1[%176, %c0_46, %c0_47] : memref<8x8x512xf32, #tpu.memory_space<vmem>>, vector<1x8x512xf32>
    %178 = vector.shape_cast %177 : vector<1x8x512xf32> to vector<8x512xf32>
    %cst_48 = arith.constant dense<0.000000e+00> : vector<8x512xf32>
    %179 = tpu.matmul %171, %3, %cst_48 {dimension_numbers = #tpu.dot_dimension_numbers<[1], [0], [0], [1], [0, 0, 1, 1], [], []>} : vector<8x128xf32>, vector<128x512xf32>, vector<8x512xf32> -> vector<8x512xf32>
    %180 = arith.addf %178, %179 : vector<8x512xf32>
    %181 = vector.extract_strided_slice %180 {offsets = [0, 0], sizes = [8, 128], strides = [1, 1]} : vector<8x512xf32> to vector<8x128xf32>
    %182 = arith.negf %181 : vector<8x128xf32>
    %183 = math.exp %182 : vector<8x128xf32>
    %cst_49 = arith.constant 1.000000e+00 : f32
    %184 = vector.broadcast %cst_49 : f32 to vector<8x128xf32>
    %185 = arith.addf %184, %183 : vector<8x128xf32>
    %186 = arith.divf %184, %185 : vector<8x128xf32>
    %187 = vector.extract_strided_slice %180 {offsets = [0, 128], sizes = [8, 128], strides = [1, 1]} : vector<8x512xf32> to vector<8x128xf32>
    %188 = arith.negf %187 : vector<8x128xf32>
    %189 = math.exp %188 : vector<8x128xf32>
    %cst_50 = arith.constant 1.000000e+00 : f32
    %190 = vector.broadcast %cst_50 : f32 to vector<8x128xf32>
    %191 = arith.addf %190, %189 : vector<8x128xf32>
    %192 = arith.divf %190, %191 : vector<8x128xf32>
    %193 = vector.extract_strided_slice %180 {offsets = [0, 256], sizes = [8, 128], strides = [1, 1]} : vector<8x512xf32> to vector<8x128xf32>
    %194 = math.tanh %193 : vector<8x128xf32>
    %195 = vector.extract_strided_slice %180 {offsets = [0, 384], sizes = [8, 128], strides = [1, 1]} : vector<8x512xf32> to vector<8x128xf32>
    %196 = arith.negf %195 : vector<8x128xf32>
    %197 = math.exp %196 : vector<8x128xf32>
    %cst_51 = arith.constant 1.000000e+00 : f32
    %198 = vector.broadcast %cst_51 : f32 to vector<8x128xf32>
    %199 = arith.addf %198, %197 : vector<8x128xf32>
    %200 = arith.divf %198, %199 : vector<8x128xf32>
    %201 = arith.mulf %192, %169 : vector<8x128xf32>
    %202 = arith.mulf %186, %194 : vector<8x128xf32>
    %203 = arith.addf %201, %202 : vector<8x128xf32>
    %204 = math.tanh %203 : vector<8x128xf32>
    %205 = arith.mulf %200, %204 : vector<8x128xf32>
    %206 = arith.index_cast %c5_i32 : i32 to index
    %c0_52 = arith.constant 0 : index
    %c0_53 = arith.constant 0 : index
    %207 = vector.load %arg3[%206, %c0_52, %c0_53] : memref<8x8x128xf32, #tpu.memory_space<vmem>>, vector<1x8x128xf32>
    %208 = vector.shape_cast %207 : vector<1x8x128xf32> to vector<8x128xf32>
    %209 = vector.shape_cast %205 : vector<8x128xf32> to vector<1x8x128xf32>
    tpu.vector_store %arg3[%206, %c0_52, %c0_53], %209 {strides = array<i32>} : memref<8x8x128xf32, #tpu.memory_space<vmem>>, vector<1x8x128xf32>,
    %c6_i32 = arith.constant 6 : i32
    %210 = arith.index_cast %c6_i32 : i32 to index
    %c0_54 = arith.constant 0 : index
    %c0_55 = arith.constant 0 : index
    %211 = vector.load %arg1[%210, %c0_54, %c0_55] : memref<8x8x512xf32, #tpu.memory_space<vmem>>, vector<1x8x512xf32>
    %212 = vector.shape_cast %211 : vector<1x8x512xf32> to vector<8x512xf32>
    %cst_56 = arith.constant dense<0.000000e+00> : vector<8x512xf32>
    %213 = tpu.matmul %205, %3, %cst_56 {dimension_numbers = #tpu.dot_dimension_numbers<[1], [0], [0], [1], [0, 0, 1, 1], [], []>} : vector<8x128xf32>, vector<128x512xf32>, vector<8x512xf32> -> vector<8x512xf32>
    %214 = arith.addf %212, %213 : vector<8x512xf32>
    %215 = vector.extract_strided_slice %214 {offsets = [0, 0], sizes = [8, 128], strides = [1, 1]} : vector<8x512xf32> to vector<8x128xf32>
    %216 = arith.negf %215 : vector<8x128xf32>
    %217 = math.exp %216 : vector<8x128xf32>
    %cst_57 = arith.constant 1.000000e+00 : f32
    %218 = vector.broadcast %cst_57 : f32 to vector<8x128xf32>
    %219 = arith.addf %218, %217 : vector<8x128xf32>
    %220 = arith.divf %218, %219 : vector<8x128xf32>
    %221 = vector.extract_strided_slice %214 {offsets = [0, 128], sizes = [8, 128], strides = [1, 1]} : vector<8x512xf32> to vector<8x128xf32>
    %222 = arith.negf %221 : vector<8x128xf32>
    %223 = math.exp %222 : vector<8x128xf32>
    %cst_58 = arith.constant 1.000000e+00 : f32
    %224 = vector.broadcast %cst_58 : f32 to vector<8x128xf32>
    %225 = arith.addf %224, %223 : vector<8x128xf32>
    %226 = arith.divf %224, %225 : vector<8x128xf32>
    %227 = vector.extract_strided_slice %214 {offsets = [0, 256], sizes = [8, 128], strides = [1, 1]} : vector<8x512xf32> to vector<8x128xf32>
    %228 = math.tanh %227 : vector<8x128xf32>
    %229 = vector.extract_strided_slice %214 {offsets = [0, 384], sizes = [8, 128], strides = [1, 1]} : vector<8x512xf32> to vector<8x128xf32>
    %230 = arith.negf %229 : vector<8x128xf32>
    %231 = math.exp %230 : vector<8x128xf32>
    %cst_59 = arith.constant 1.000000e+00 : f32
    %232 = vector.broadcast %cst_59 : f32 to vector<8x128xf32>
    %233 = arith.addf %232, %231 : vector<8x128xf32>
    %234 = arith.divf %232, %233 : vector<8x128xf32>
    %235 = arith.mulf %226, %203 : vector<8x128xf32>
    %236 = arith.mulf %220, %228 : vector<8x128xf32>
    %237 = arith.addf %235, %236 : vector<8x128xf32>
    %238 = math.tanh %237 : vector<8x128xf32>
    %239 = arith.mulf %234, %238 : vector<8x128xf32>
    %240 = arith.index_cast %c6_i32 : i32 to index
    %c0_60 = arith.constant 0 : index
    %c0_61 = arith.constant 0 : index
    %241 = vector.load %arg3[%240, %c0_60, %c0_61] : memref<8x8x128xf32, #tpu.memory_space<vmem>>, vector<1x8x128xf32>
    %242 = vector.shape_cast %241 : vector<1x8x128xf32> to vector<8x128xf32>
    %243 = vector.shape_cast %239 : vector<8x128xf32> to vector<1x8x128xf32>
    tpu.vector_store %arg3[%240, %c0_60, %c0_61], %243 {strides = array<i32>} : memref<8x8x128xf32, #tpu.memory_space<vmem>>, vector<1x8x128xf32>,
    %c7_i32 = arith.constant 7 : i32
    %244 = arith.index_cast %c7_i32 : i32 to index
    %c0_62 = arith.constant 0 : index
    %c0_63 = arith.constant 0 : index
    %245 = vector.load %arg1[%244, %c0_62, %c0_63] : memref<8x8x512xf32, #tpu.memory_space<vmem>>, vector<1x8x512xf32>
    %246 = vector.shape_cast %245 : vector<1x8x512xf32> to vector<8x512xf32>
    %cst_64 = arith.constant dense<0.000000e+00> : vector<8x512xf32>
    %247 = tpu.matmul %239, %3, %cst_64 {dimension_numbers = #tpu.dot_dimension_numbers<[1], [0], [0], [1], [0, 0, 1, 1], [], []>} : vector<8x128xf32>, vector<128x512xf32>, vector<8x512xf32> -> vector<8x512xf32>
    %248 = arith.addf %246, %247 : vector<8x512xf32>
    %249 = vector.extract_strided_slice %248 {offsets = [0, 0], sizes = [8, 128], strides = [1, 1]} : vector<8x512xf32> to vector<8x128xf32>
    %250 = arith.negf %249 : vector<8x128xf32>
    %251 = math.exp %250 : vector<8x128xf32>
    %cst_65 = arith.constant 1.000000e+00 : f32
    %252 = vector.broadcast %cst_65 : f32 to vector<8x128xf32>
    %253 = arith.addf %252, %251 : vector<8x128xf32>
    %254 = arith.divf %252, %253 : vector<8x128xf32>
    %255 = vector.extract_strided_slice %248 {offsets = [0, 128], sizes = [8, 128], strides = [1, 1]} : vector<8x512xf32> to vector<8x128xf32>
    %256 = arith.negf %255 : vector<8x128xf32>
    %257 = math.exp %256 : vector<8x128xf32>
    %cst_66 = arith.constant 1.000000e+00 : f32
    %258 = vector.broadcast %cst_66 : f32 to vector<8x128xf32>
    %259 = arith.addf %258, %257 : vector<8x128xf32>
    %260 = arith.divf %258, %259 : vector<8x128xf32>
    %261 = vector.extract_strided_slice %248 {offsets = [0, 256], sizes = [8, 128], strides = [1, 1]} : vector<8x512xf32> to vector<8x128xf32>
    %262 = math.tanh %261 : vector<8x128xf32>
    %263 = vector.extract_strided_slice %248 {offsets = [0, 384], sizes = [8, 128], strides = [1, 1]} : vector<8x512xf32> to vector<8x128xf32>
    %264 = arith.negf %263 : vector<8x128xf32>
    %265 = math.exp %264 : vector<8x128xf32>
    %cst_67 = arith.constant 1.000000e+00 : f32
    %266 = vector.broadcast %cst_67 : f32 to vector<8x128xf32>
    %267 = arith.addf %266, %265 : vector<8x128xf32>
    %268 = arith.divf %266, %267 : vector<8x128xf32>
    %269 = arith.mulf %260, %237 : vector<8x128xf32>
    %270 = arith.mulf %254, %262 : vector<8x128xf32>
    %271 = arith.addf %269, %270 : vector<8x128xf32>
    %272 = math.tanh %271 : vector<8x128xf32>
    %273 = arith.mulf %268, %272 : vector<8x128xf32>
    %274 = arith.index_cast %c7_i32 : i32 to index
    %c0_68 = arith.constant 0 : index
    %c0_69 = arith.constant 0 : index
    %275 = vector.load %arg3[%274, %c0_68, %c0_69] : memref<8x8x128xf32, #tpu.memory_space<vmem>>, vector<1x8x128xf32>
    %276 = vector.shape_cast %275 : vector<1x8x128xf32> to vector<8x128xf32>
    %277 = vector.shape_cast %273 : vector<8x128xf32> to vector<1x8x128xf32>
    tpu.vector_store %arg3[%274, %c0_68, %c0_69], %277 {strides = array<i32>} : memref<8x8x128xf32, #tpu.memory_space<vmem>>, vector<1x8x128xf32>,
    %c8_i32 = arith.constant 8 : i32
    %c0_70 = arith.constant 0 : index
    %c0_71 = arith.constant 0 : index
    %278 = vector.load %arg4[%c0_70, %c0_71] : memref<8x128xf32, #tpu.memory_space<vmem>>, vector<8x128xf32>
    tpu.vector_store %arg4[%c0_70, %c0_71], %273 {strides = array<i32>} : memref<8x128xf32, #tpu.memory_space<vmem>>, vector<8x128xf32>,
    %c0_72 = arith.constant 0 : index
    %c0_73 = arith.constant 0 : index
    %279 = vector.load %arg5[%c0_72, %c0_73] : memref<8x128xf32, #tpu.memory_space<vmem>>, vector<8x128xf32>
    tpu.vector_store %arg5[%c0_72, %c0_73], %271 {strides = array<i32>} : memref<8x128xf32, #tpu.memory_space<vmem>>, vector<8x128xf32>,
    return
  }
  func.func @transform_0(%arg0: i32) -> (i32, i32, i32) {
    %c0_i32 = arith.constant 0 : i32
    %c0_i32_0 = arith.constant 0 : i32
    %c0_i32_1 = arith.constant 0 : i32
    return %arg0, %c0_i32, %c0_i32_0 : i32, i32, i32
  }
  func.func @transform_1(%arg0: i32) -> (i32, i32) {
    %c0_i32 = arith.constant 0 : i32
    %c0_i32_0 = arith.constant 0 : i32
    %c0_i32_1 = arith.constant 0 : i32
    return %c0_i32, %c0_i32_0 : i32, i32
  }
  func.func @transform_2(%arg0: i32) -> (i32, i32, i32) {
    %c0_i32 = arith.constant 0 : i32
    %c0_i32_0 = arith.constant 0 : i32
    %c0_i32_1 = arith.constant 0 : i32
    return %arg0, %c0_i32, %c0_i32_0 : i32, i32, i32
  }
}

</mosaic_0001>

<bundles_post_ra>
// kernel: tpu_custom_call.1
= control target key start
LH: loop header
LB: loop body
LE: loop exit
PB: predicated region body
PF: predicated region fallthrough
CT: control target
= control target key end

     0   :  { %7 = vsyncpa [#allocation5], 0  ;;  %s2498_s0 = inlined_call_operand.hbm [shape: f32[8,8,512], index: 0, kind: input, shape index: {}]   ;;  %s2499_s1 = inlined_call_operand.hbm [shape: f32[128,512], index: 1, kind: input, shape index: {}]   ;;  %s2500_s2 = inlined_call_operand.hbm [shape: f32[8,8,128], index: 2, kind: output, shape index: {}]  }
   0x1   :  { %8 = vsyncpa [#allocation8], 0 }
   0x2   :  { %9 = vsyncpa [#allocation6], 0  ;;  %s14_s11 = sshll.u32 %s2498_s0, 4  ;;  %s1670_s12 = smov [#allocation4]   ;;  %s15_s11 = int_to_ptr.hbm [resolvable:$true] %s14_s11 }
   0x3   :  { %s16_s13 = sshll.u32 %s1670_s12, 4  ;;  %s27_s16 = sshll.u32 %s2499_s1, 4  ;;  %s17_s13 = int_to_ptr.vmem [resolvable:$true] %s16_s13  ;;  %s28_s16 = int_to_ptr.hbm [resolvable:$true] %s27_s16 }
   0x4   :  { %s1671_s17 = smov 512   ;;  %s1672_s18 = smov 32  }
   0x5   :  { %22 = dma.hbm_to_vmem [thread:$0]  %s15_s11, 4096, %s17_s13, [#allocation5], %s1671_s17, %s1671_s17, %s1672_s18  }
   0x6   :  { %s1673_s19 = smov [#allocation7]  }
   0x7   :  { %s29_s20 = sshll.u32 %s1673_s19, 4  ;;  %s30_s20 = int_to_ptr.vmem [resolvable:$true] %s29_s20 }
   0x8   :  { %35 = dma.hbm_to_vmem [thread:$0]  %s28_s16, 8192, %s30_s20, [#allocation8], %s1671_s17, %s1671_s17, %s1672_s18  }
   0x9   :  { %1664 = dma.done.wait [#allocation5], 4096  }
   0xa   :  { %1665 = vsyncadd [#allocation5], 4294963200 }
   0xb   :  { %1666 = dma.done.wait [#allocation8], 8192  }
   0xc   :  { %1667 = vsyncadd [#allocation8], 4294959104  ;;  %v1699_v0 = vld [vmem:[#allocation7 + $0x1e0] sm:$0xff]  ;;  %v1701_v1 = vld [vmem:[#allocation7 + $0x1e8] sm:$0xff]  ;;  %v1674_v60 = vmov 0.0   ;;  %s1675_s0 = smov [#allocation9]  }
   0xd   :  { %2607 = vst [vmem:[#allocation13_spill] sm:$0xff] %v1699_v0  ;;  %v1703_v2 = vld [vmem:[#allocation7 + $0x1f8] sm:$0xff]  ;;  %120 = vmatpush.msra.mxu0 %v1699_v0  ;;  %140 = vmatpush.msra.mxu1 %v1701_v1  ;;  %v1707_v3 = vld [vmem:[#allocation7 + $0x1c0] sm:$0xff]  ;;  %v1709_v4 = vld [vmem:[#allocation7 + $0x1c8] sm:$0xff]  ;;  %s1352_s1 = sshll.u32 %s1675_s0, 4  ;;  %s1354_s23 = sshll.u32 %s2500_s2, 4  ;;  %s1353_s1 = int_to_ptr.vmem [resolvable:$true] %s1352_s1  ;;  %s1355_s23 = int_to_ptr.hbm [resolvable:$true] %s1354_s23 }
   0xe   :  { %v1711_v5 = vld [vmem:[#allocation7 + $0x1d8] sm:$0xff]  ;;  %180 = vmatpush.msra.mxu3 %v1703_v2  ;;  %v1714_v6 = vld [vmem:[#allocation7 + $0x1a0] sm:$0xff]  ;;  %v1716_v7 = vld [vmem:[#allocation7 + $0x1a8] sm:$0xff]  ;;  %s1676_s24 = smov 128   ;;  %s1677_s25 = smov 8  }
   0xf   :  { %121 = vmatpush.msra.mxu0 %v1707_v3  ;;  %141 = vmatpush.msra.mxu1 %v1709_v4  ;;  %v1720_v8 = vld [vmem:[#allocation7 + $0x1b8] sm:$0xff]  ;;  %v1723_v9 = vld [vmem:[#allocation7 + $0x180] sm:$0xff]  ;;  %v1725_v10 = vld [vmem:[#allocation7 + $0x188] sm:$0xff] }
  0x10   :  { %181 = vmatpush.msra.mxu3 %v1711_v5  ;;  %v1729_v11 = vld [vmem:[#allocation7 + $0x198] sm:$0xff]  ;;  %v1732_v12 = vld [vmem:[#allocation7 + $0x160] sm:$0xff]  ;;  %v1734_v13 = vld [vmem:[#allocation7 + $0x168] sm:$0xff] }
  0x11   :  { %122 = vmatpush.msra.mxu0 %v1714_v6  ;;  %142 = vmatpush.msra.mxu1 %v1716_v7  ;;  %v1738_v14 = vld [vmem:[#allocation7 + $0x178] sm:$0xff]  ;;  %v1741_v15 = vld [vmem:[#allocation7 + $0x140] sm:$0xff]  ;;  %v1743_v16 = vld [vmem:[#allocation7 + $0x148] sm:$0xff] }
  0x12   :  { %182 = vmatpush.msra.mxu3 %v1720_v8  ;;  %v1745_v17 = vld [vmem:[#allocation7 + $0x1f0] sm:$0xff]  ;;  %v1749_v18 = vld [vmem:[#allocation7 + $0x158] sm:$0xff]  ;;  %v1754_v20 = vld [vmem:[#allocation7 + $0x120] sm:$0xff] }
  0x13   :  { %123 = vmatpush.msra.mxu0 %v1723_v9  ;;  %143 = vmatpush.msra.mxu1 %v1725_v10  ;;  %v1751_v19 = vld [vmem:[#allocation7 + $0x1d0] sm:$0xff]  ;;  %v1756_v21 = vld [vmem:[#allocation7 + $0x128] sm:$0xff]  ;;  %v1761_v22 = vld [vmem:[#allocation7 + $0x138] sm:$0xff] }
  0x14   :  { %183 = vmatpush.msra.mxu3 %v1729_v11  ;;  %160 = vmatpush.msra.mxu2 %v1745_v17  ;;  %v1763_v23 = vld [vmem:[#allocation7 + $0x1b0] sm:$0xff]  ;;  %v1766_v24 = vld [vmem:[#allocation7 + $0x100] sm:$0xff]  ;;  %v1768_v25 = vld [vmem:[#allocation7 + $0x108] sm:$0xff] }
  0x15   :  { %124 = vmatpush.msra.mxu0 %v1732_v12  ;;  %144 = vmatpush.msra.mxu1 %v1734_v13  ;;  %v1773_v26 = vld [vmem:[#allocation7 + $0x118] sm:$0xff]  ;;  %v1775_v27 = vld [vmem:[#allocation7 + $0x190] sm:$0xff]  ;;  %v1778_v28 = vld [vmem:[#allocation7 + $0xe0] sm:$0xff] }
  0x16   :  { %184 = vmatpush.msra.mxu3 %v1738_v14  ;;  %161 = vmatpush.msra.mxu2 %v1751_v19  ;;  %v1780_v29 = vld [vmem:[#allocation7 + $0xe8] sm:$0xff]  ;;  %v1785_v30 = vld [vmem:[#allocation7 + $0xf8] sm:$0xff]  ;;  %v1787_v31 = vld [vmem:[#allocation7 + $0x170] sm:$0xff] }
  0x17   :  { %125 = vmatpush.msra.mxu0 %v1741_v15  ;;  %145 = vmatpush.msra.mxu1 %v1743_v16  ;;  %v1790_v32 = vld [vmem:[#allocation7 + $0xc0] sm:$0xff]  ;;  %v1792_v33 = vld [vmem:[#allocation7 + $0xc8] sm:$0xff]  ;;  %v1797_v34 = vld [vmem:[#allocation7 + $0xd8] sm:$0xff] }
  0x18   :  { %185 = vmatpush.msra.mxu3 %v1749_v18  ;;  %162 = vmatpush.msra.mxu2 %v1763_v23  ;;  %2608 = vst [vmem:[#allocation14_spill] sm:$0xff] %v1797_v34  ;;  %v1799_v35 = vld [vmem:[#allocation7 + $0x150] sm:$0xff]  ;;  %v1802_v36 = vld [vmem:[#allocation7 + $0xa0] sm:$0xff]  ;;  %v1804_v37 = vld [vmem:[#allocation7 + $0xa8] sm:$0xff] }
  0x19   :  { %126 = vmatpush.msra.mxu0 %v1754_v20  ;;  %146 = vmatpush.msra.mxu1 %v1756_v21  ;;  %2609 = vst [vmem:[#allocation15_spill] sm:$0xff] %v1802_v36  ;;  %v1809_v38 = vld [vmem:[#allocation7 + $0xb8] sm:$0xff]  ;;  %v1811_v39 = vld [vmem:[#allocation7 + $0x130] sm:$0xff]  ;;  %v1814_v40 = vld [vmem:[#allocation7 + $0x80] sm:$0xff] }
  0x1a   :  { %186 = vmatpush.msra.mxu3 %v1761_v22  ;;  %163 = vmatpush.msra.mxu2 %v1775_v27  ;;  %2610 = vst [vmem:[#allocation16_spill] sm:$0xff] %v1804_v37  ;;  %v1816_v41 = vld [vmem:[#allocation7 + $0x88] sm:$0xff]  ;;  %v1821_v42 = vld [vmem:[#allocation7 + $0x98] sm:$0xff]  ;;  %v1823_v43 = vld [vmem:[#allocation7 + $0x110] sm:$0xff] }
  0x1b   :  { %127 = vmatpush.msra.mxu0 %v1766_v24  ;;  %147 = vmatpush.msra.mxu1 %v1768_v25  ;;  %2611 = vst [vmem:[#allocation17_spill] sm:$0xff] %v1809_v38  ;;  %v1826_v44 = vld [vmem:[#allocation7 + $0x60] sm:$0xff]  ;;  %v1828_v45 = vld [vmem:[#allocation7 + $0x68] sm:$0xff]  ;;  %v1833_v46 = vld [vmem:[#allocation7 + $0x78] sm:$0xff] }
  0x1c   :  { %187 = vmatpush.msra.mxu3 %v1773_v26  ;;  %164 = vmatpush.msra.mxu2 %v1787_v31  ;;  %2612 = vst [vmem:[#allocation18_spill] sm:$0xff] %v1814_v40  ;;  %v1835_v47 = vld [vmem:[#allocation7 + $0xf0] sm:$0xff]  ;;  %v1838_v48 = vld [vmem:[#allocation7 + $0x40] sm:$0xff]  ;;  %v1840_v49 = vld [vmem:[#allocation7 + $0x48] sm:$0xff] }
  0x1d   :  { %128 = vmatpush.msra.mxu0 %v1778_v28  ;;  %148 = vmatpush.msra.mxu1 %v1780_v29  ;;  %2613 = vst [vmem:[#allocation19_spill] sm:$0xff] %v1816_v41  ;;  %v1845_v50 = vld [vmem:[#allocation7 + $0x58] sm:$0xff]  ;;  %v1847_v51 = vld [vmem:[#allocation7 + $0xd0] sm:$0xff]  ;;  %v1850_v52 = vld [vmem:[#allocation7 + $0x20] sm:$0xff] }
  0x1e   :  { %188 = vmatpush.msra.mxu3 %v1785_v30  ;;  %165 = vmatpush.msra.mxu2 %v1799_v35  ;;  %2614 = vst [vmem:[#allocation20_spill] sm:$0xff] %v1821_v42  ;;  %v1852_v53 = vld [vmem:[#allocation7 + $0x28] sm:$0xff]  ;;  %v1857_v54 = vld [vmem:[#allocation7 + $0x38] sm:$0xff]  ;;  %v1859_v55 = vld [vmem:[#allocation7 + $0xb0] sm:$0xff] }
  0x1f   :  { %129 = vmatpush.msra.mxu0 %v1790_v32  ;;  %149 = vmatpush.msra.mxu1 %v1792_v33  ;;  %2615 = vst [vmem:[#allocation21_spill] sm:$0xff] %v1826_v44  ;;  %v1862_v56 = vld [vmem:[#allocation7] sm:$0xff]  ;;  %v1864_v57 = vld [vmem:[#allocation7 + $0x8] sm:$0xff]  ;;  %v1869_v58 = vld [vmem:[#allocation7 + $0x18] sm:$0xff] }
  0x20   :  { %189 = vmatpush.msra.mxu3 %v1797_v34  ;;  %2616 = vst [vmem:[#allocation22_spill] sm:$0xff] %v1828_v45  ;;  %166 = vmatpush.msra.mxu2 %v1811_v39  ;;  %v1875_v59 = vld [vmem:[#allocation7 + $0x90] sm:$0xff] }
  0x21   :  { %130 = vmatpush.msra.mxu0 %v1802_v36  ;;  %150 = vmatpush.msra.mxu1 %v1804_v37  ;;  %2617 = vst [vmem:[#allocation23_spill] sm:$0xff] %v1833_v46  ;;  %v1878_v61 = vld [vmem:[#allocation7 + $0x70] sm:$0xff] }
  0x22   :  { %190 = vmatpush.msra.mxu3 %v1809_v38  ;;  %2618 = vst [vmem:[#allocation24_spill] sm:$0xff] %v1838_v48  ;;  %167 = vmatpush.msra.mxu2 %v1823_v43  ;;  %v1882_v62 = vld [vmem:[#allocation7 + $0x50] sm:$0xff] }
  0x23   :  { %131 = vmatpush.msra.mxu0 %v1814_v40  ;;  %151 = vmatpush.msra.mxu1 %v1816_v41  ;;  %2619 = vst [vmem:[#allocation25_spill] sm:$0xff] %v1840_v49  ;;  %v1888_v63 = vld [vmem:[#allocation7 + $0x30] sm:$0xff] }
  0x24   :  { %191 = vmatpush.msra.mxu3 %v1821_v42  ;;  %2620 = vst [vmem:[#allocation26_spill] sm:$0xff] %v1845_v50  ;;  %168 = vmatpush.msra.mxu2 %v1835_v47 }
  0x25   :  { %132 = vmatpush.msra.mxu0 %v1826_v44  ;;  %152 = vmatpush.msra.mxu1 %v1828_v45  ;;  %2621 = vst [vmem:[#allocation27_spill] sm:$0xff] %v1847_v51 }
  0x26   :  { %192 = vmatpush.msra.mxu3 %v1833_v46  ;;  %2622 = vst [vmem:[#allocation28_spill] sm:$0xff] %v1850_v52  ;;  %169 = vmatpush.msra.mxu2 %v1847_v51 }
  0x27   :  { %2623 = vst [vmem:[#allocation29_spill] sm:$0xff] %v1852_v53  ;;  %133 = vmatpush.msra.mxu0 %v1838_v48  ;;  %153 = vmatpush.msra.mxu1 %v1840_v49 }
  0x28   :  { %2624 = vst [vmem:[#allocation30_spill] sm:$0xff] %v1857_v54  ;;  %193 = vmatpush.msra.mxu3 %v1845_v50  ;;  %170 = vmatpush.msra.mxu2 %v1859_v55 }
  0x29   :  { %2625 = vst [vmem:[#allocation31_spill] sm:$0xff] %v1859_v55  ;;  %134 = vmatpush.msra.mxu0 %v1850_v52  ;;  %154 = vmatpush.msra.mxu1 %v1852_v53 }
  0x2a   :  { %2626 = vst [vmem:[#allocation32_spill] sm:$0xff] %v1862_v56  ;;  %194 = vmatpush.msra.mxu3 %v1857_v54  ;;  %171 = vmatpush.msra.mxu2 %v1875_v59 }
  0x2b   :  { %2627 = vst [vmem:[#allocation33_spill] sm:$0xff] %v1864_v57  ;;  %135 = vmatpush.msra.mxu0 %v1862_v56  ;;  %155 = vmatpush.msra.mxu1 %v1864_v57 }
  0x2c   :  { %2628 = vst [vmem:[#allocation34_spill] sm:$0xff] %v1869_v58  ;;  %195 = vmatpush.msra.mxu3 %v1869_v58  ;;  %136 = vmatmul.f32.vlgmr.msra.gmra.mxu0 %v1674_v60 }
  0x2d   :  { %2629 = vst [vmem:[#allocation35_spill] sm:$0xff] %v1875_v59  ;;  %156 = vmatmul.f32.vlgmr.msra.gmra.mxu1 %v1674_v60  ;;  %196 = vmatmul.f32.vlgmr.msra.gmra.mxu3 %v1674_v60 }
  0x2e   :  { %2630 = vst [vmem:[#allocation36_spill] sm:$0xff] %v1878_v61  ;;  %273 = vmatpush.msrb.mxu0 %v1699_v0  ;;  %293 = vmatpush.msrb.mxu1 %v1701_v1  ;;  %v1894_v0 = vld [vmem:[#allocation7 + $0x10] sm:$0xff] }
  0x2f   :  { %2631 = vst [vmem:[#allocation37_spill] sm:$0xff] %v1882_v62  ;;  %333 = vmatpush.msrb.mxu3 %v1703_v2  ;;  %172 = vmatpush.msra.mxu2 %v1878_v61 }
  0x30   :  { %274 = vmatpush.msrb.mxu0 %v1707_v3  ;;  %2632 = vst [vmem:[#allocation38_spill] sm:$0xff] %v1888_v63  ;;  %294 = vmatpush.msrb.mxu1 %v1709_v4 }
  0x31   :  { %334 = vmatpush.msrb.mxu3 %v1711_v5  ;;  %173 = vmatpush.msra.mxu2 %v1882_v62  ;;  %2633 = vst [vmem:[#allocation39_spill] sm:$0xff] %v1894_v0 }
  0x32   :  { %275 = vmatpush.msrb.mxu0 %v1714_v6  ;;  %295 = vmatpush.msrb.mxu1 %v1716_v7 }
  0x33   :  { %335 = vmatpush.msrb.mxu3 %v1720_v8  ;;  %174 = vmatpush.msra.mxu2 %v1888_v63 }
  0x34   :  { %276 = vmatpush.msrb.mxu0 %v1723_v9  ;;  %296 = vmatpush.msrb.mxu1 %v1725_v10 }
  0x35   :  { %336 = vmatpush.msrb.mxu3 %v1729_v11  ;;  %175 = vmatpush.msra.mxu2 %v1894_v0 }
  0x36   :  { %277 = vmatpush.msrb.mxu0 %v1732_v12  ;;  %176 = vmatmul.f32.vlgmr.msra.gmra.mxu2 %v1674_v60  ;;  %v2634_v60 = vld [vmem:[#allocation13_spill] sm:$0xff] }
  0x37   :  { %297 = vmatpush.msrb.mxu1 %v1734_v13  ;;  %313 = vmatpush.msrb.mxu2 %v1745_v17 }
  0x38   :  { %337 = vmatpush.msrb.mxu3 %v1738_v14  ;;  %278 = vmatpush.msrb.mxu0 %v1741_v15 }
  0x39   :  { %298 = vmatpush.msrb.mxu1 %v1743_v16  ;;  %314 = vmatpush.msrb.mxu2 %v1751_v19 }
  0x3a   :  { %338 = vmatpush.msrb.mxu3 %v1749_v18  ;;  %279 = vmatpush.msrb.mxu0 %v1754_v20 }
  0x3b   :  { %299 = vmatpush.msrb.mxu1 %v1756_v21  ;;  %315 = vmatpush.msrb.mxu2 %v1763_v23 }
  0x3c   :  { %339 = vmatpush.msrb.mxu3 %v1761_v22  ;;  %280 = vmatpush.msrb.mxu0 %v1766_v24 }
  0x3d   :  { %300 = vmatpush.msrb.mxu1 %v1768_v25  ;;  %316 = vmatpush.msrb.mxu2 %v1775_v27 }
  0x3e   :  { %340 = vmatpush.msrb.mxu3 %v1773_v26  ;;  %281 = vmatpush.msrb.mxu0 %v1778_v28 }
  0x3f   :  { %301 = vmatpush.msrb.mxu1 %v1780_v29  ;;  %317 = vmatpush.msrb.mxu2 %v1787_v31 }
  0x40   :  { %341 = vmatpush.msrb.mxu3 %v1785_v30  ;;  %282 = vmatpush.msrb.mxu0 %v1790_v32 }
  0x41   :  { %302 = vmatpush.msrb.mxu1 %v1792_v33  ;;  %318 = vmatpush.msrb.mxu2 %v1799_v35 }
  0x42   :  { %342 = vmatpush.msrb.mxu3 %v1797_v34  ;;  %283 = vmatpush.msrb.mxu0 %v1802_v36 }
  0x43   :  { %303 = vmatpush.msrb.mxu1 %v1804_v37  ;;  %319 = vmatpush.msrb.mxu2 %v1811_v39 }
  0x44   :  { %343 = vmatpush.msrb.mxu3 %v1809_v38  ;;  %284 = vmatpush.msrb.mxu0 %v1814_v40 }
  0x45   :  { %304 = vmatpush.msrb.mxu1 %v1816_v41  ;;  %320 = vmatpush.msrb.mxu2 %v1823_v43 }
  0x46   :  { %344 = vmatpush.msrb.mxu3 %v1821_v42  ;;  %285 = vmatpush.msrb.mxu0 %v1826_v44 }
  0x47   :  { %305 = vmatpush.msrb.mxu1 %v1828_v45  ;;  %321 = vmatpush.msrb.mxu2 %v1835_v47 }
  0x48   :  { %345 = vmatpush.msrb.mxu3 %v1833_v46  ;;  %286 = vmatpush.msrb.mxu0 %v1838_v48 }
  0x49   :  { %306 = vmatpush.msrb.mxu1 %v1840_v49  ;;  %322 = vmatpush.msrb.mxu2 %v1847_v51 }
  0x4a   :  { %346 = vmatpush.msrb.mxu3 %v1845_v50  ;;  %287 = vmatpush.msrb.mxu0 %v1850_v52 }
  0x4b   :  { %307 = vmatpush.msrb.mxu1 %v1852_v53  ;;  %323 = vmatpush.msrb.mxu2 %v1859_v55 }
  0x4c   :  { %347 = vmatpush.msrb.mxu3 %v1857_v54  ;;  %288 = vmatpush.msrb.mxu0 %v1862_v56 }
  0x4d   :  { %308 = vmatpush.msrb.mxu1 %v1864_v57  ;;  %324 = vmatpush.msrb.mxu2 %v1875_v59 }
  0x4e   :  { %348 = vmatpush.msrb.mxu3 %v1869_v58  ;;  %427 = vmatpush.msra.mxu0 %v2634_v60 }
  0x4f   :  { %447 = vmatpush.msra.mxu1 %v1701_v1  ;;  %325 = vmatpush.msrb.mxu2 %v1878_v61 }
  0x50   :  { %487 = vmatpush.msra.mxu3 %v1703_v2  ;;  %428 = vmatpush.msra.mxu0 %v1707_v3 }
  0x51   :  { %448 = vmatpush.msra.mxu1 %v1709_v4  ;;  %326 = vmatpush.msrb.mxu2 %v1882_v62 }
  0x52   :  { %488 = vmatpush.msra.mxu3 %v1711_v5  ;;  %429 = vmatpush.msra.mxu0 %v1714_v6 }
  0x53   :  { %449 = vmatpush.msra.mxu1 %v1716_v7  ;;  %327 = vmatpush.msrb.mxu2 %v1888_v63 }
  0x54   :  { %489 = vmatpush.msra.mxu3 %v1720_v8  ;;  %430 = vmatpush.msra.mxu0 %v1723_v9 }
  0x55   :  { %450 = vmatpush.msra.mxu1 %v1725_v10  ;;  %328 = vmatpush.msrb.mxu2 %v1894_v0 }
  0x56   :  { %490 = vmatpush.msra.mxu3 %v1729_v11  ;;  %431 = vmatpush.msra.mxu0 %v1732_v12 }
  0x57   :  { %467 = vmatpush.msra.mxu2 %v1745_v17  ;;  %451 = vmatpush.msra.mxu1 %v1734_v13 }
  0x58   :  { %491 = vmatpush.msra.mxu3 %v1738_v14  ;;  %432 = vmatpush.msra.mxu0 %v1741_v15 }
  0x59   :  { %468 = vmatpush.msra.mxu2 %v1751_v19  ;;  %452 = vmatpush.msra.mxu1 %v1743_v16 }
  0x5a   :  { %492 = vmatpush.msra.mxu3 %v1749_v18  ;;  %433 = vmatpush.msra.mxu0 %v1754_v20 }
  0x5b   :  { %469 = vmatpush.msra.mxu2 %v1763_v23  ;;  %453 = vmatpush.msra.mxu1 %v1756_v21 }
  0x5c   :  { %493 = vmatpush.msra.mxu3 %v1761_v22  ;;  %434 = vmatpush.msra.mxu0 %v1766_v24 }
  0x5d   :  { %470 = vmatpush.msra.mxu2 %v1775_v27  ;;  %454 = vmatpush.msra.mxu1 %v1768_v25 }
  0x5e   :  { %494 = vmatpush.msra.mxu3 %v1773_v26  ;;  %435 = vmatpush.msra.mxu0 %v1778_v28 }
  0x5f   :  { %471 = vmatpush.msra.mxu2 %v1787_v31  ;;  %455 = vmatpush.msra.mxu1 %v1780_v29 }
  0x60   :  { %495 = vmatpush.msra.mxu3 %v1785_v30  ;;  %436 = vmatpush.msra.mxu0 %v1790_v32 }
  0x61   :  { %472 = vmatpush.msra.mxu2 %v1799_v35  ;;  %456 = vmatpush.msra.mxu1 %v1792_v33 }
  0x62   :  { %496 = vmatpush.msra.mxu3 %v1797_v34  ;;  %437 = vmatpush.msra.mxu0 %v1802_v36 }
  0x63   :  { %473 = vmatpush.msra.mxu2 %v1811_v39  ;;  %457 = vmatpush.msra.mxu1 %v1804_v37 }
  0x64   :  { %497 = vmatpush.msra.mxu3 %v1809_v38  ;;  %438 = vmatpush.msra.mxu0 %v1814_v40 }
  0x65   :  { %474 = vmatpush.msra.mxu2 %v1823_v43  ;;  %458 = vmatpush.msra.mxu1 %v1816_v41 }
  0x66   :  { %498 = vmatpush.msra.mxu3 %v1821_v42  ;;  %439 = vmatpush.msra.mxu0 %v1826_v44 }
  0x67   :  { %475 = vmatpush.msra.mxu2 %v1835_v47  ;;  %459 = vmatpush.msra.mxu1 %v1828_v45 }
  0x68   :  { %499 = vmatpush.msra.mxu3 %v1833_v46  ;;  %440 = vmatpush.msra.mxu0 %v1838_v48 }
  0x69   :  { %476 = vmatpush.msra.mxu2 %v1847_v51  ;;  %460 = vmatpush.msra.mxu1 %v1840_v49 }
  0x6a   :  { %500 = vmatpush.msra.mxu3 %v1845_v50  ;;  %441 = vmatpush.msra.mxu0 %v1850_v52  ;;  %v116_v52 = vld [vmem:[#allocation4] sm:$0xff] }
  0x6b   :  { %477 = vmatpush.msra.mxu2 %v1859_v55  ;;  %461 = vmatpush.msra.mxu1 %v1852_v53  ;;  %v117_v53 = vld [vmem:[#allocation4 + $0x8] sm:$0xff] }
  0x6c   :  { %501 = vmatpush.msra.mxu3 %v1857_v54  ;;  %442 = vmatpush.msra.mxu0 %v1862_v56 }
  0x6d   :  { %478 = vmatpush.msra.mxu2 %v1875_v59  ;;  %462 = vmatpush.msra.mxu1 %v1864_v57  ;;  %v119_v57 = vld [vmem:[#allocation4 + $0x18] sm:$0xff] }
  0x6e   :  { %502 = vmatpush.msra.mxu3 %v1869_v58 }
  0x6f   :  { %479 = vmatpush.msra.mxu2 %v1878_v61 }
  0x71   :  { %480 = vmatpush.msra.mxu2 %v1882_v62 }
  0x73   :  { %481 = vmatpush.msra.mxu2 %v1888_v63 }
  0x75   :  { %482 = vmatpush.msra.mxu2 %v1894_v0  ;;  %v118_v0 = vld [vmem:[#allocation4 + $0x10] sm:$0xff] }
  0xa9   :  { %v137_v50 = vpop.f32.mrf.mxu0 }
  0xaa   :  { %v200_v54 = vadd.f32 %v137_v50, %v116_v52  ;;  %v157_v49 = vpop.f32.mrf.mxu1 }
  0xab   :  { %v201_v48 = vadd.f32 %v157_v49, %v117_v53 }
  0xac   :  { %v1368_v46 = vmul.f32 -1.442695, %v200_v54 }
  0xad   :  { %v1369_v56 = vmul.f32 -1.442695, %v201_v48 }
  0xae   :  { %1400 = vpow2.f32 %v1368_v46 }
  0xaf   :  { %1402 = vpow2.f32 %v1369_v56 }
  0xb0   :  { %v197_v58 = vpop.f32.mrf.mxu3 }
  0xb1   :  { %v203_v45 = vadd.f32 %v197_v58, %v119_v57 }
  0xb3   :  { %v1370_v61 = vmul.f32 -1.442695, %v203_v45 }
  0xb4   :  { %v1401_v44 = vpop.eup %1400 }
  0xb5   :  { %v1403_v62 = vpop.eup %1402  ;;  %v207_v42 = vadd.f32 1.0, %v1401_v44  ;;  %1404 = vpow2.f32 %v1370_v61 }
  0xb6   :  { %v226_v63 = vadd.f32 1.0, %v1403_v62 }
  0xb7   :  { %1406 = vrcp.f32 %v207_v42  ;;  %v219_v57 = vand.u32 2147483648, %v207_v42  ;;  %v217_v61 = vand.u32 2147483647, %v207_v42  ;;  %vm213_vm2 = vweird.f32 %v207_v42 }
  0xb8   :  { %1408 = vrcp.f32 %v226_v63  ;;  %v238_v58 = vand.u32 2147483648, %v226_v63  ;;  %v236_v41 = vand.u32 2147483647, %v226_v63  ;;  %vm232_vm3 = vweird.f32 %v226_v63 }
  0xb9   :  { %v177_v59 = vpop.f32.mrf.mxu2  ;;  %vm218_vm5 = vcmp.eq.f32.partialorder %v217_v61, 8.507059e+37  ;;  %v2642_v61 = vld [vmem:[#allocation19_spill] sm:$0xff] }
  0xba   :  { %v202_v52 = vadd.f32 %v177_v59, %v118_v0  ;;  %vm237_vm7 = vcmp.eq.f32.partialorder %v236_v41, 8.507059e+37 }
  0xbb   :  { %v1405_v50 = vpop.eup %1404 }
  0xbc   :  { %v246_v49 = vadd.f32 1.0, %v1405_v50  ;;  %v220_v50 = vor.u32 1.1754944e-38, %v219_v57 }
  0xbd   :  { %v1407_v53 = vpop.eup %1406 }
  0xbe   :  { %v1409_v48 = vpop.eup %1408  ;;  %v209_v46 = vmul.f32 %v1407_v53, %v207_v42  ;;  %1410 = vrcp.f32 %v246_v49  ;;  %vm214_vm0 = vweird.f32 %v1407_v53  ;;  %vm252_vm9 = vweird.f32 %v246_v49 }
  0xbf   :  { %v228_v54 = vmul.f32 %v1409_v48, %v226_v63  ;;  %1412 = vtanh.f32 %v202_v52  ;;  %vm233_vm1 = vweird.f32 %v1409_v48  ;;  %vm215_vm4 = vmor %vm213_vm2, %vm214_vm0  ;;  %v239_v52 = vor.u32 1.1754944e-38, %v238_v58 }
  0xc0   :  { %v210_v56 = vsub.f32 1.0, %v209_v46  ;;  %vm234_vm6 = vmor %vm232_vm3, %vm233_vm1  ;;  %v258_v63 = vand.u32 2147483648, %v246_v49  ;;  %v256_v57 = vand.u32 2147483647, %v246_v49 }
  0xc1   :  { %v229_v45 = vsub.f32 1.0, %v228_v54 }
  0xc2   :  { %v211_v44 = vmul.f32 %v1407_v53, %v210_v56  ;;  %vm257_vm11 = vcmp.eq.f32.partialorder %v256_v57, 8.507059e+37  ;;  %v2654_v57 = vld [vmem:[#allocation29_spill] sm:$0xff] }
  0xc3   :  { %v230_v62 = vmul.f32 %v1409_v48, %v229_v45 }
  0xc4   :  { %v1411_v40 = vpop.eup %1410  ;;  %v212_v38 = vadd.f32 %v1407_v53, %v211_v44 }
  0xc5   :  { %v1413_v0 = vpop.eup %1412  ;;  %v248_v59 = vmul.f32 %v1411_v40, %v246_v49  ;;  %v231_v55 = vadd.f32 %v1409_v48, %v230_v62  ;;  %vm253_vm8 = vweird.f32 %v1411_v40  ;;  %v2640_v49 = vld [vmem:[#allocation17_spill] sm:$0xff]  ;;  %v2643_v62 = vld [vmem:[#allocation35_spill] sm:$0xff] }
  0xc6   :  { %v216_v46 = vsel %vm215_vm4, %v1407_v53, %v212_v38  ;;  %vm254_vm10 = vmor %vm252_vm9, %vm253_vm8  ;;  %v259_v53 = vor.u32 1.1754944e-38, %v258_v63  ;;  %v2653_v63 = vld [vmem:[#allocation28_spill] sm:$0xff] }
  0xc7   :  { %v249_v54 = vsub.f32 1.0, %v248_v59  ;;  %v221_v56 = vsel %vm218_vm5, %v220_v50, %v216_v46  ;;  %v235_v37 = vsel %vm234_vm6, %v1409_v48, %v231_v55  ;;  %v2641_v48 = vld [vmem:[#allocation18_spill] sm:$0xff]  ;;  %v2645_v59 = vld [vmem:[#allocation21_spill] sm:$0xff]  ;;  %v2648_v46 = vld [vmem:[#allocation23_spill] sm:$0xff] }
  0xc8   :  { %v240_v45 = vsel %vm237_vm7, %v239_v52, %v235_v37  ;;  %v263_v36 = vmul.f32 %v1413_v0, %v221_v56  ;;  %v2637_v37 = vld [vmem:[#allocation15_spill] sm:$0xff]  ;;  %v2644_v0 = vld [vmem:[#allocation20_spill] sm:$0xff]  ;;  %v2646_v50 = vld [vmem:[#allocation22_spill] sm:$0xff] }
  0xc9   :  { %v250_v34 = vmul.f32 %v1411_v40, %v249_v54  ;;  %v262_v51 = vmul.f32 0.0, %v240_v45  ;;  %v2647_v52 = vld [vmem:[#allocation36_spill] sm:$0xff]  ;;  %v2650_v56 = vld [vmem:[#allocation25_spill] sm:$0xff] }
  0xca   :  { %v2649_v54 = vld [vmem:[#allocation24_spill] sm:$0xff]  ;;  %v2651_v45 = vld [vmem:[#allocation37_spill] sm:$0xff] }
  0xcb   :  { %v2019_v44 = vadd.f32 %v263_v36, %v262_v51  ;;  %v251_v42 = vadd.f32 %v1411_v40, %v250_v34  ;;  %v2635_v34 = vld [vmem:[#allocation27_spill] sm:$0xff]  ;;  %v2636_v36 = vld [vmem:[#allocation14_spill] sm:$0xff] }
  0xcc   :  { %v2639_v51 = vld [vmem:[#allocation31_spill] sm:$0xff] }
  0xcd   :  { %1414 = vtanh.f32 %v2019_v44  ;;  %v255_v38 = vsel %vm254_vm10, %v1411_v40, %v251_v42  ;;  %v2638_v40 = vld [vmem:[#allocation16_spill] sm:$0xff]  ;;  %v2652_v42 = vld [vmem:[#allocation26_spill] sm:$0xff] }
  0xce   :  { %v260_v55 = vsel %vm257_vm11, %v259_v53, %v255_v38  ;;  %v2655_v38 = vld [vmem:[#allocation38_spill] sm:$0xff] }
  0xcf   :  { %v2656_v53 = vld [vmem:[#allocation30_spill] sm:$0xff] }
  0xd3   :  { %v1415_v58 = vpop.eup %1414 }
  0xd4   :  { %v266_v41 = vmul.f32 %v1415_v58, %v260_v55  ;;  %v2657_v58 = vld [vmem:[#allocation32_spill] sm:$0xff]  ;;  %v2658_v55 = vld [vmem:[#allocation33_spill] sm:$0xff] }
  0xd6   :  { %267 = vst [vmem:[#allocation9] sm:$0xff] %v266_v41  ;;  %289 = vmatmul.f32.vlgmr.msrb.gmra.mxu0 %v266_v41  ;;  %309 = vmatmul.f32.vlgmr.msrb.gmra.mxu1 %v266_v41 }
  0xd7   :  { %329 = vmatmul.f32.vlgmr.msrb.gmra.mxu2 %v266_v41  ;;  %349 = vmatmul.f32.vlgmr.msrb.gmra.mxu3 %v266_v41  ;;  %v2659_v41 = vld [vmem:[#allocation39_spill] sm:$0xff] }
  0xd8   :  { %581 = vmatpush.msrb.mxu0 %v2634_v60  ;;  %601 = vmatpush.msrb.mxu1 %v1701_v1 }
  0xd9   :  { %621 = vmatpush.msrb.mxu2 %v1745_v17  ;;  %641 = vmatpush.msrb.mxu3 %v1703_v2 }
  0xda   :  { %582 = vmatpush.msrb.mxu0 %v1707_v3  ;;  %602 = vmatpush.msrb.mxu1 %v1709_v4 }
  0xdb   :  { %622 = vmatpush.msrb.mxu2 %v1751_v19  ;;  %642 = vmatpush.msrb.mxu3 %v1711_v5 }
  0xdc   :  { %583 = vmatpush.msrb.mxu0 %v1714_v6  ;;  %603 = vmatpush.msrb.mxu1 %v1716_v7 }
  0xdd   :  { %623 = vmatpush.msrb.mxu2 %v1763_v23  ;;  %643 = vmatpush.msrb.mxu3 %v1720_v8 }
  0xde   :  { %584 = vmatpush.msrb.mxu0 %v1723_v9  ;;  %604 = vmatpush.msrb.mxu1 %v1725_v10 }
  0xdf   :  { %624 = vmatpush.msrb.mxu2 %v1775_v27  ;;  %644 = vmatpush.msrb.mxu3 %v1729_v11 }
  0xe0   :  { %585 = vmatpush.msrb.mxu0 %v1732_v12  ;;  %605 = vmatpush.msrb.mxu1 %v1734_v13 }
  0xe1   :  { %625 = vmatpush.msrb.mxu2 %v1787_v31  ;;  %645 = vmatpush.msrb.mxu3 %v1738_v14 }
  0xe2   :  { %586 = vmatpush.msrb.mxu0 %v1741_v15  ;;  %606 = vmatpush.msrb.mxu1 %v1743_v16 }
  0xe3   :  { %626 = vmatpush.msrb.mxu2 %v1799_v35  ;;  %646 = vmatpush.msrb.mxu3 %v1749_v18 }
  0xe4   :  { %587 = vmatpush.msrb.mxu0 %v1754_v20  ;;  %607 = vmatpush.msrb.mxu1 %v1756_v21 }
  0xe5   :  { %627 = vmatpush.msrb.mxu2 %v1811_v39  ;;  %647 = vmatpush.msrb.mxu3 %v1761_v22 }
  0xe6   :  { %588 = vmatpush.msrb.mxu0 %v1766_v24  ;;  %608 = vmatpush.msrb.mxu1 %v1768_v25 }
  0xe7   :  { %628 = vmatpush.msrb.mxu2 %v1823_v43  ;;  %648 = vmatpush.msrb.mxu3 %v1773_v26 }
  0xe8   :  { %589 = vmatpush.msrb.mxu0 %v1778_v28  ;;  %609 = vmatpush.msrb.mxu1 %v1780_v29 }
  0xe9   :  { %629 = vmatpush.msrb.mxu2 %v1835_v47  ;;  %649 = vmatpush.msrb.mxu3 %v1785_v30 }
  0xea   :  { %590 = vmatpush.msrb.mxu0 %v1790_v32  ;;  %610 = vmatpush.msrb.mxu1 %v1792_v33 }
  0xeb   :  { %630 = vmatpush.msrb.mxu2 %v2635_v34  ;;  %650 = vmatpush.msrb.mxu3 %v2636_v36 }
  0xec   :  { %591 = vmatpush.msrb.mxu0 %v2637_v37  ;;  %611 = vmatpush.msrb.mxu1 %v2638_v40 }
  0xed   :  { %631 = vmatpush.msrb.mxu2 %v2639_v51  ;;  %651 = vmatpush.msrb.mxu3 %v2640_v49 }
  0xee   :  { %592 = vmatpush.msrb.mxu0 %v2641_v48  ;;  %612 = vmatpush.msrb.mxu1 %v2642_v61 }
  0xef   :  { %632 = vmatpush.msrb.mxu2 %v2643_v62  ;;  %652 = vmatpush.msrb.mxu3 %v2644_v0 }
  0xf0   :  { %593 = vmatpush.msrb.mxu0 %v2645_v59  ;;  %613 = vmatpush.msrb.mxu1 %v2646_v50 }
  0xf1   :  { %633 = vmatpush.msrb.mxu2 %v2647_v52  ;;  %653 = vmatpush.msrb.mxu3 %v2648_v46 }
  0xf2   :  { %594 = vmatpush.msrb.mxu0 %v2649_v54  ;;  %614 = vmatpush.msrb.mxu1 %v2650_v56  ;;  %v2660_v54 = vld [vmem:[#allocation34_spill] sm:$0xff]  ;;  %v269_v56 = vld [vmem:[#allocation4 + $0x20] sm:$0xff] }
  0xf3   :  { %634 = vmatpush.msrb.mxu2 %v2651_v45  ;;  %654 = vmatpush.msrb.mxu3 %v2652_v42  ;;  %v270_v45 = vld [vmem:[#allocation4 + $0x28] sm:$0xff] }
  0xf4   :  { %595 = vmatpush.msrb.mxu0 %v2653_v63  ;;  %615 = vmatpush.msrb.mxu1 %v2654_v57 }
  0xf5   :  { %635 = vmatpush.msrb.mxu2 %v2655_v38  ;;  %655 = vmatpush.msrb.mxu3 %v2656_v53  ;;  %v272_v38 = vld [vmem:[#allocation4 + $0x38] sm:$0xff] }
  0xf6   :  { %596 = vmatpush.msrb.mxu0 %v2657_v58  ;;  %616 = vmatpush.msrb.mxu1 %v2658_v55 }
  0xf7   :  { %636 = vmatpush.msrb.mxu2 %v2659_v41  ;;  %656 = vmatpush.msrb.mxu3 %v2660_v54  ;;  %v271_v54 = vld [vmem:[#allocation4 + $0x30] sm:$0xff] }
 0x153   :  { %v290_v46 = vpop.f32.mrf.mxu0  ;;  %v310_v42 = vpop.f32.mrf.mxu1 }
 0x154   :  { %v353_v52 = vadd.f32 %v290_v46, %v269_v56  ;;  %v354_v63 = vadd.f32 %v310_v42, %v270_v45 }
 0x156   :  { %v1371_v50 = vmul.f32 -1.442695, %v353_v52  ;;  %v1372_v57 = vmul.f32 -1.442695, %v354_v63 }
 0x158   :  { %1416 = vpow2.f32 %v1371_v50 }
 0x159   :  { %1418 = vpow2.f32 %v1372_v57 }
 0x15a   :  { %v350_v53 = vpop.f32.mrf.mxu3  ;;  %v330_v61 = vpop.f32.mrf.mxu2 }
 0x15b   :  { %v356_v59 = vadd.f32 %v350_v53, %v272_v38  ;;  %v355_v52 = vadd.f32 %v330_v61, %v271_v54 }
 0x15d   :  { %v1373_v58 = vmul.f32 -1.442695, %v356_v59 }
 0x15e   :  { %v1417_v0 = vpop.eup %1416 }
 0x15f   :  { %v1419_v55 = vpop.eup %1418  ;;  %v360_v62 = vadd.f32 1.0, %v1417_v0  ;;  %1420 = vpow2.f32 %v1373_v58 }
 0x160   :  { %v379_v41 = vadd.f32 1.0, %v1419_v55 }
 0x161   :  { %1422 = vrcp.f32 %v360_v62  ;;  %v372_v59 = vand.u32 2147483648, %v360_v62  ;;  %v370_v53 = vand.u32 2147483647, %v360_v62  ;;  %vm366_vm14 = vweird.f32 %v360_v62 }
 0x162   :  { %1424 = vrcp.f32 %v379_v41  ;;  %v391_v38 = vand.u32 2147483648, %v379_v41  ;;  %v389_v55 = vand.u32 2147483647, %v379_v41  ;;  %vm385_vm15 = vweird.f32 %v379_v41 }
 0x163   :  { %vm371_vm2 = vcmp.eq.f32.partialorder %v370_v53, 8.507059e+37 }
 0x164   :  { %vm390_vm3 = vcmp.eq.f32.partialorder %v389_v55, 8.507059e+37 }
 0x165   :  { %v1421_v48 = vpop.eup %1420 }
 0x166   :  { %v399_v46 = vadd.f32 1.0, %v1421_v48  ;;  %v373_v48 = vor.u32 1.1754944e-38, %v372_v59 }
 0x167   :  { %v1423_v56 = vpop.eup %1422 }
 0x168   :  { %v1425_v45 = vpop.eup %1424  ;;  %v362_v50 = vmul.f32 %v1423_v56, %v360_v62  ;;  %1426 = vrcp.f32 %v399_v46  ;;  %vm367_vm12 = vweird.f32 %v1423_v56  ;;  %v411_v59 = vand.u32 2147483648, %v399_v46 }
 0x169   :  { %v381_v42 = vmul.f32 %v1425_v45, %v379_v41  ;;  %1428 = vtanh.f32 %v355_v52  ;;  %vm386_vm13 = vweird.f32 %v1425_v45  ;;  %vm368_vm0 = vmor %vm366_vm14, %vm367_vm12  ;;  %vm405_vm5 = vweird.f32 %v399_v46 }
 0x16a   :  { %v363_v63 = vsub.f32 1.0, %v362_v50  ;;  %vm387_vm1 = vmor %vm385_vm15, %vm386_vm13  ;;  %v392_v50 = vor.u32 1.1754944e-38, %v391_v38  ;;  %v412_v38 = vor.u32 1.1754944e-38, %v411_v59 }
 0x16b   :  { %v382_v57 = vsub.f32 1.0, %v381_v42 }
 0x16c   :  { %v364_v0 = vmul.f32 %v1423_v56, %v363_v63 }
 0x16d   :  { %v383_v58 = vmul.f32 %v1425_v45, %v382_v57 }
 0x16e   :  { %v1427_v49 = vpop.eup %1426  ;;  %v365_v51 = vadd.f32 %v1423_v56, %v364_v0 }
 0x16f   :  { %v384_v61 = vadd.f32 %v1425_v45, %v383_v58  ;;  %v401_v54 = vmul.f32 %v1427_v49, %v399_v46  ;;  %v1429_v52 = vpop.eup %1428  ;;  %vm406_vm4 = vweird.f32 %v1427_v49 }
 0x170   :  { %v369_v42 = vsel %vm368_vm0, %v1423_v56, %v365_v51  ;;  %v409_v51 = vand.u32 2147483647, %v399_v46  ;;  %vm407_vm6 = vmor %vm405_vm5, %vm406_vm4 }
 0x171   :  { %v374_v40 = vsel %vm371_vm2, %v373_v48, %v369_v42  ;;  %v388_v63 = vsel %vm387_vm1, %v1425_v45, %v384_v61  ;;  %v402_v37 = vsub.f32 1.0, %v401_v54 }
 0x172   :  { %v393_v57 = vsel %vm390_vm3, %v392_v50, %v388_v63  ;;  %v416_v36 = vmul.f32 %v1429_v52, %v374_v40  ;;  %vm410_vm7 = vcmp.eq.f32.partialorder %v409_v51, 8.507059e+37  ;;  %v425_v40 = vld [vmem:[#allocation4 + $0x50] sm:$0xff] }
 0x173   :  { %v415_v34 = vmul.f32 %v393_v57, %v2019_v44  ;;  %v403_v0 = vmul.f32 %v1427_v49, %v402_v37 }
 0x175   :  { %v2087_v62 = vadd.f32 %v416_v36, %v415_v34  ;;  %v404_v41 = vadd.f32 %v1427_v49, %v403_v0 }
 0x177   :  { %1430 = vtanh.f32 %v2087_v62  ;;  %v408_v56 = vsel %vm407_vm6, %v1427_v49, %v404_v41 }
 0x178   :  { %v413_v53 = vsel %vm410_vm7, %v412_v38, %v408_v56 }
 0x17d   :  { %v1431_v45 = vpop.eup %1430 }
 0x17e   :  { %v419_v58 = vmul.f32 %v1431_v45, %v413_v53 }
 0x180   :  { %421 = vst [vmem:[#allocation9 + $0x8] sm:$0xff] %v419_v58  ;;  %443 = vmatmul.f32.vlgmr.msra.gmra.mxu0 %v419_v58  ;;  %463 = vmatmul.f32.vlgmr.msra.gmra.mxu1 %v419_v58 }
 0x181   :  { %483 = vmatmul.f32.vlgmr.msra.gmra.mxu2 %v419_v58  ;;  %503 = vmatmul.f32.vlgmr.msra.gmra.mxu3 %v419_v58 }
 0x182   :  { %735 = vmatpush.msra.mxu0 %v2634_v60  ;;  %755 = vmatpush.msra.mxu1 %v1701_v1  ;;  %v2661_v1 = vld [vmem:[#allocation27_spill] sm:$0xff] }
 0x183   :  { %775 = vmatpush.msra.mxu2 %v1745_v17  ;;  %795 = vmatpush.msra.mxu3 %v1703_v2  ;;  %v2662_v2 = vld [vmem:[#allocation14_spill] sm:$0xff]  ;;  %v2677_v17 = vld [vmem:[#allocation37_spill] sm:$0xff] }
 0x184   :  { %736 = vmatpush.msra.mxu0 %v1707_v3  ;;  %756 = vmatpush.msra.mxu1 %v1709_v4  ;;  %v2663_v3 = vld [vmem:[#allocation15_spill] sm:$0xff]  ;;  %v2664_v4 = vld [vmem:[#allocation16_spill] sm:$0xff] }
 0x185   :  { %776 = vmatpush.msra.mxu2 %v1751_v19  ;;  %796 = vmatpush.msra.mxu3 %v1711_v5  ;;  %v2665_v5 = vld [vmem:[#allocation31_spill] sm:$0xff]  ;;  %v2679_v19 = vld [vmem:[#allocation28_spill] sm:$0xff] }
 0x186   :  { %737 = vmatpush.msra.mxu0 %v1714_v6  ;;  %757 = vmatpush.msra.mxu1 %v1716_v7  ;;  %v2666_v6 = vld [vmem:[#allocation17_spill] sm:$0xff]  ;;  %v2667_v7 = vld [vmem:[#allocation18_spill] sm:$0xff] }
 0x187   :  { %777 = vmatpush.msra.mxu2 %v1763_v23  ;;  %797 = vmatpush.msra.mxu3 %v1720_v8  ;;  %v2668_v8 = vld [vmem:[#allocation19_spill] sm:$0xff]  ;;  %v2683_v23 = vld [vmem:[#allocation32_spill] sm:$0xff] }
 0x188   :  { %738 = vmatpush.msra.mxu0 %v1723_v9  ;;  %758 = vmatpush.msra.mxu1 %v1725_v10  ;;  %v2669_v9 = vld [vmem:[#allocation35_spill] sm:$0xff]  ;;  %v2670_v10 = vld [vmem:[#allocation20_spill] sm:$0xff] }
 0x189   :  { %778 = vmatpush.msra.mxu2 %v1775_v27  ;;  %798 = vmatpush.msra.mxu3 %v1729_v11  ;;  %v2671_v11 = vld [vmem:[#allocation21_spill] sm:$0xff] }
 0x18a   :  { %739 = vmatpush.msra.mxu0 %v1732_v12  ;;  %759 = vmatpush.msra.mxu1 %v1734_v13  ;;  %v2672_v12 = vld [vmem:[#allocation22_spill] sm:$0xff]  ;;  %v2673_v13 = vld [vmem:[#allocation36_spill] sm:$0xff]  ;;  %v423_v27 = vld [vmem:[#allocation4 + $0x40] sm:$0xff] }
 0x18b   :  { %779 = vmatpush.msra.mxu2 %v1787_v31  ;;  %799 = vmatpush.msra.mxu3 %v1738_v14  ;;  %v2674_v14 = vld [vmem:[#allocation23_spill] sm:$0xff] }
 0x18c   :  { %740 = vmatpush.msra.mxu0 %v1741_v15  ;;  %760 = vmatpush.msra.mxu1 %v1743_v16  ;;  %v2675_v15 = vld [vmem:[#allocation24_spill] sm:$0xff]  ;;  %v2676_v16 = vld [vmem:[#allocation25_spill] sm:$0xff] }
 0x18d   :  { %780 = vmatpush.msra.mxu2 %v1799_v35  ;;  %800 = vmatpush.msra.mxu3 %v1749_v18  ;;  %v2678_v18 = vld [vmem:[#allocation26_spill] sm:$0xff] }
 0x18e   :  { %741 = vmatpush.msra.mxu0 %v1754_v20  ;;  %761 = vmatpush.msra.mxu1 %v1756_v21  ;;  %v2680_v20 = vld [vmem:[#allocation29_spill] sm:$0xff]  ;;  %v2681_v21 = vld [vmem:[#allocation38_spill] sm:$0xff] }
 0x18f   :  { %781 = vmatpush.msra.mxu2 %v1811_v39  ;;  %801 = vmatpush.msra.mxu3 %v1761_v22  ;;  %v2682_v22 = vld [vmem:[#allocation30_spill] sm:$0xff]  ;;  %v426_v39 = vld [vmem:[#allocation4 + $0x58] sm:$0xff] }
 0x190   :  { %742 = vmatpush.msra.mxu0 %v1766_v24  ;;  %762 = vmatpush.msra.mxu1 %v1768_v25  ;;  %v2684_v24 = vld [vmem:[#allocation33_spill] sm:$0xff]  ;;  %v2685_v25 = vld [vmem:[#allocation39_spill] sm:$0xff] }
 0x191   :  { %782 = vmatpush.msra.mxu2 %v1823_v43  ;;  %802 = vmatpush.msra.mxu3 %v1773_v26  ;;  %v2686_v26 = vld [vmem:[#allocation34_spill] sm:$0xff] }
 0x192   :  { %743 = vmatpush.msra.mxu0 %v1778_v28  ;;  %763 = vmatpush.msra.mxu1 %v1780_v29  ;;  %v424_v28 = vld [vmem:[#allocation4 + $0x48] sm:$0xff] }
 0x193   :  { %783 = vmatpush.msra.mxu2 %v1835_v47  ;;  %803 = vmatpush.msra.mxu3 %v1785_v30 }
 0x194   :  { %744 = vmatpush.msra.mxu0 %v1790_v32  ;;  %764 = vmatpush.msra.mxu1 %v1792_v33 }
 0x195   :  { %784 = vmatpush.msra.mxu2 %v2661_v1  ;;  %804 = vmatpush.msra.mxu3 %v2662_v2 }
 0x196   :  { %745 = vmatpush.msra.mxu0 %v2663_v3  ;;  %765 = vmatpush.msra.mxu1 %v2664_v4 }
 0x197   :  { %785 = vmatpush.msra.mxu2 %v2665_v5  ;;  %805 = vmatpush.msra.mxu3 %v2666_v6 }
 0x198   :  { %746 = vmatpush.msra.mxu0 %v2667_v7  ;;  %766 = vmatpush.msra.mxu1 %v2668_v8 }
 0x199   :  { %786 = vmatpush.msra.mxu2 %v2669_v9  ;;  %806 = vmatpush.msra.mxu3 %v2670_v10 }
 0x19a   :  { %747 = vmatpush.msra.mxu0 %v2671_v11  ;;  %767 = vmatpush.msra.mxu1 %v2672_v12 }
 0x19b   :  { %787 = vmatpush.msra.mxu2 %v2673_v13  ;;  %807 = vmatpush.msra.mxu3 %v2674_v14 }
 0x19c   :  { %748 = vmatpush.msra.mxu0 %v2675_v15  ;;  %768 = vmatpush.msra.mxu1 %v2676_v16 }
 0x19d   :  { %788 = vmatpush.msra.mxu2 %v2677_v17  ;;  %808 = vmatpush.msra.mxu3 %v2678_v18 }
 0x19e   :  { %749 = vmatpush.msra.mxu0 %v2679_v19  ;;  %769 = vmatpush.msra.mxu1 %v2680_v20 }
 0x19f   :  { %789 = vmatpush.msra.mxu2 %v2681_v21  ;;  %809 = vmatpush.msra.mxu3 %v2682_v22  ;;  %v2161_v21 = vld [vmem:[#allocation7 + $0x1e8] sm:$0xff]  ;;  %v2164_v22 = vld [vmem:[#allocation7 + $0x1f0] sm:$0xff] }
 0x1a0   :  { %750 = vmatpush.msra.mxu0 %v2683_v23  ;;  %770 = vmatpush.msra.mxu1 %v2684_v24  ;;  %v2167_v23 = vld [vmem:[#allocation7 + $0x1f8] sm:$0xff]  ;;  %v2170_v24 = vld [vmem:[#allocation7 + $0x1c0] sm:$0xff] }
 0x1a1   :  { %790 = vmatpush.msra.mxu2 %v2685_v25  ;;  %810 = vmatpush.msra.mxu3 %v2686_v26  ;;  %v2173_v25 = vld [vmem:[#allocation7 + $0x1c8] sm:$0xff]  ;;  %v2176_v26 = vld [vmem:[#allocation7 + $0x1d0] sm:$0xff] }
 0x1fd   :  { %v444_v29 = vpop.f32.mrf.mxu0  ;;  %v464_v30 = vpop.f32.mrf.mxu1 }
 0x1fe   :  { %v507_v31 = vadd.f32 %v444_v29, %v423_v27  ;;  %v508_v32 = vadd.f32 %v464_v30, %v424_v28  ;;  %v2179_v27 = vld [vmem:[#allocation7 + $0x1d8] sm:$0xff]  ;;  %v2182_v28 = vld [vmem:[#allocation7 + $0x1a0] sm:$0xff]  ;;  %v2185_v29 = vld [vmem:[#allocation7 + $0x1a8] sm:$0xff] }
 0x1ff   :  { %v2188_v30 = vld [vmem:[#allocation7 + $0x1b0] sm:$0xff] }
 0x200   :  { %v1374_v33 = vmul.f32 -1.442695, %v507_v31  ;;  %v1375_v35 = vmul.f32 -1.442695, %v508_v32  ;;  %v2191_v31 = vld [vmem:[#allocation7 + $0x1b8] sm:$0xff]  ;;  %v2194_v32 = vld [vmem:[#allocation7 + $0x180] sm:$0xff] }
 0x202   :  { %1432 = vpow2.f32 %v1374_v33  ;;  %v2197_v33 = vld [vmem:[#allocation7 + $0x188] sm:$0xff] }
 0x203   :  { %1434 = vpow2.f32 %v1375_v35  ;;  %v2200_v35 = vld [vmem:[#allocation7 + $0x190] sm:$0xff] }
 0x204   :  { %v504_v43 = vpop.f32.mrf.mxu3  ;;  %v484_v49 = vpop.f32.mrf.mxu2 }
 0x205   :  { %v510_v47 = vadd.f32 %v504_v43, %v426_v39  ;;  %v509_v61 = vadd.f32 %v484_v49, %v425_v40  ;;  %v2203_v39 = vld [vmem:[#allocation7 + $0x198] sm:$0xff]  ;;  %v2206_v43 = vld [vmem:[#allocation7 + $0x160] sm:$0xff] }
 0x206   :  { %v2227_v40 = vld [vmem:[#allocation7 + $0x158] sm:$0xff]  ;;  %v2230_v49 = vld [vmem:[#allocation7 + $0x120] sm:$0xff] }
 0x207   :  { %v1376_v60 = vmul.f32 -1.442695, %v510_v47  ;;  %v2209_v47 = vld [vmem:[#allocation7 + $0x168] sm:$0xff] }
 0x208   :  { %v1433_v44 = vpop.eup %1432 }
 0x209   :  { %v1435_v34 = vpop.eup %1434  ;;  %v514_v36 = vadd.f32 1.0, %v1433_v44  ;;  %1436 = vpow2.f32 %v1376_v60  ;;  %v2212_v60 = vld [vmem:[#allocation7 + $0x170] sm:$0xff]  ;;  %v2215_v44 = vld [vmem:[#allocation7 + $0x178] sm:$0xff] }
 0x20a   :  { %v533_v37 = vadd.f32 1.0, %v1435_v34  ;;  %v2218_v34 = vld [vmem:[#allocation7 + $0x140] sm:$0xff] }
 0x20b   :  { %1438 = vrcp.f32 %v514_v36  ;;  %v526_v57 = vand.u32 2147483648, %v514_v36  ;;  %v524_v59 = vand.u32 2147483647, %v514_v36  ;;  %vm520_vm10 = vweird.f32 %v514_v36 }
 0x20c   :  { %1440 = vrcp.f32 %v533_v37  ;;  %v545_v0 = vand.u32 2147483648, %v533_v37  ;;  %v543_v56 = vand.u32 2147483647, %v533_v37  ;;  %vm539_vm11 = vweird.f32 %v533_v37 }
 0x20d   :  { %v527_v53 = vor.u32 1.1754944e-38, %v526_v57  ;;  %vm525_vm14 = vcmp.eq.f32.partialorder %v524_v59, 8.507059e+37  ;;  %v2260_v57 = vld [vmem:[#allocation7 + $0xf0] sm:$0xff]  ;;  %v2269_v59 = vld [vmem:[#allocation7 + $0xc8] sm:$0xff] }
 0x20e   :  { %v546_v2 = vor.u32 1.1754944e-38, %v545_v0  ;;  %vm544_vm15 = vcmp.eq.f32.partialorder %v543_v56, 8.507059e+37  ;;  %v2263_v0 = vld [vmem:[#allocation7 + $0xf8] sm:$0xff] }
 0x20f   :  { %v1437_v46 = vpop.eup %1436  ;;  %v2275_v56 = vld [vmem:[#allocation7 + $0xd8] sm:$0xff] }
 0x210   :  { %v553_v55 = vadd.f32 1.0, %v1437_v46  ;;  %v2233_v46 = vld [vmem:[#allocation7 + $0x128] sm:$0xff]  ;;  %2688 = vst [vmem:[#allocation27_spill] sm:$0xff] %v2275_v56 }
 0x211   :  { %v1439_v48 = vpop.eup %1438 }
 0x212   :  { %v1441_v54 = vpop.eup %1440  ;;  %v516_v50 = vmul.f32 %v1439_v48, %v514_v36  ;;  %1442 = vrcp.f32 %v553_v55  ;;  %vm521_vm8 = vweird.f32 %v1439_v48  ;;  %v565_v14 = vand.u32 2147483648, %v553_v55  ;;  %v2221_v36 = vld [vmem:[#allocation7 + $0x148] sm:$0xff] }
 0x213   :  { %v535_v42 = vmul.f32 %v1441_v54, %v533_v37  ;;  %1444 = vtanh.f32 %v509_v61  ;;  %vm540_vm9 = vweird.f32 %v1441_v54  ;;  %vm522_vm12 = vmor %vm520_vm10, %vm521_vm8  ;;  %vm559_vm1 = vweird.f32 %v553_v55  ;;  %v2224_v37 = vld [vmem:[#allocation7 + $0x150] sm:$0xff]  ;;  %v2242_v61 = vld [vmem:[#allocation7 + $0x100] sm:$0xff] }
 0x214   :  { %v517_v52 = vsub.f32 1.0, %v516_v50  ;;  %vm541_vm13 = vmor %vm539_vm11, %vm540_vm9  ;;  %v563_v15 = vand.u32 2147483647, %v553_v55  ;;  %v566_v17 = vor.u32 1.1754944e-38, %v565_v14  ;;  %v2248_v50 = vld [vmem:[#allocation7 + $0x110] sm:$0xff]  ;;  %v2326_v14 = vld [vmem:[#allocation7 + $0x20] sm:$0xff] }
 0x215   :  { %v536_v63 = vsub.f32 1.0, %v535_v42  ;;  %v2251_v42 = vld [vmem:[#allocation7 + $0x118] sm:$0xff]  ;;  %2705 = vst [vmem:[#allocation26_spill] sm:$0xff] %v2326_v14 }
 0x216   :  { %v518_v41 = vmul.f32 %v1439_v48, %v517_v52  ;;  %vm564_vm3 = vcmp.eq.f32.partialorder %v563_v15, 8.507059e+37  ;;  %v2254_v52 = vld [vmem:[#allocation7 + $0xe0] sm:$0xff]  ;;  %v2329_v15 = vld [vmem:[#allocation7 + $0x28] sm:$0xff] }
 0x217   :  { %v537_v51 = vmul.f32 %v1441_v54, %v536_v63  ;;  %v2257_v63 = vld [vmem:[#allocation7 + $0xe8] sm:$0xff]  ;;  %2706 = vst [vmem:[#allocation28_spill] sm:$0xff] %v2329_v15 }
 0x218   :  { %v1443_v38 = vpop.eup %1442  ;;  %v519_v45 = vadd.f32 %v1439_v48, %v518_v41  ;;  %v2266_v41 = vld [vmem:[#allocation7 + $0xc0] sm:$0xff] }
 0x219   :  { %v538_v58 = vadd.f32 %v1441_v54, %v537_v51  ;;  %v555_v1 = vmul.f32 %v1443_v38, %v553_v55  ;;  %v1445_v4 = vpop.eup %1444  ;;  %vm560_vm0 = vweird.f32 %v1443_v38  ;;  %v2236_v55 = vld [vmem:[#allocation7 + $0x130] sm:$0xff] }
 0x21a   :  { %v523_v3 = vsel %vm522_vm12, %v1439_v48, %v519_v45  ;;  %vm561_vm2 = vmor %vm559_vm1, %vm560_vm0  ;;  %v2239_v48 = vld [vmem:[#allocation7 + $0x138] sm:$0xff]  ;;  %v2272_v51 = vld [vmem:[#allocation7 + $0xd0] sm:$0xff] }
 0x21b   :  { %v528_v5 = vsel %vm525_vm14, %v527_v53, %v523_v3  ;;  %v542_v6 = vsel %vm541_vm13, %v1441_v54, %v538_v58  ;;  %v556_v7 = vsub.f32 1.0, %v555_v1  ;;  %v2245_v54 = vld [vmem:[#allocation7 + $0x108] sm:$0xff]  ;;  %2687 = vst [vmem:[#allocation13_spill] sm:$0xff] %v2272_v51  ;;  %v2284_v53 = vld [vmem:[#allocation7 + $0xb0] sm:$0xff]  ;;  %v2287_v58 = vld [vmem:[#allocation7 + $0xb8] sm:$0xff] }
 0x21c   :  { %v547_v8 = vsel %vm544_vm15, %v546_v2, %v542_v6  ;;  %v570_v9 = vmul.f32 %v1445_v4, %v528_v5  ;;  %v2281_v45 = vld [vmem:[#allocation7 + $0xa8] sm:$0xff]  ;;  %2691 = vst [vmem:[#allocation16_spill] sm:$0xff] %v2284_v53  ;;  %v2290_v1 = vld [vmem:[#allocation7 + $0x80] sm:$0xff]  ;;  %v2296_v3 = vld [vmem:[#allocation7 + $0x90] sm:$0xff] }
 0x21d   :  { %v569_v10 = vmul.f32 %v547_v8, %v2087_v62  ;;  %v557_v11 = vmul.f32 %v1443_v38, %v556_v7  ;;  %v2158_v62 = vld [vmem:[#allocation7 + $0x1e0] sm:$0xff]  ;;  %2690 = vst [vmem:[#allocation15_spill] sm:$0xff] %v2281_v45  ;;  %v2293_v2 = vld [vmem:[#allocation7 + $0x88] sm:$0xff]  ;;  %v2299_v4 = vld [vmem:[#allocation7 + $0x98] sm:$0xff] }
 0x21e   :  { %2692 = vst [vmem:[#allocation31_spill] sm:$0xff] %v2287_v58  ;;  %v2302_v5 = vld [vmem:[#allocation7 + $0x60] sm:$0xff]  ;;  %v2305_v6 = vld [vmem:[#allocation7 + $0x68] sm:$0xff]  ;;  %v2308_v7 = vld [vmem:[#allocation7 + $0x70] sm:$0xff] }
 0x21f   :  { %v2155_v12 = vadd.f32 %v570_v9, %v569_v10  ;;  %v558_v13 = vadd.f32 %v1443_v38, %v557_v11  ;;  %2693 = vst [vmem:[#allocation17_spill] sm:$0xff] %v2290_v1  ;;  %v2311_v8 = vld [vmem:[#allocation7 + $0x78] sm:$0xff]  ;;  %v2314_v9 = vld [vmem:[#allocation7 + $0x40] sm:$0xff]  ;;  %v2317_v10 = vld [vmem:[#allocation7 + $0x48] sm:$0xff] }
 0x220   :  { %2694 = vst [vmem:[#allocation18_spill] sm:$0xff] %v2293_v2  ;;  %v2320_v11 = vld [vmem:[#allocation7 + $0x50] sm:$0xff] }
 0x221   :  { %1446 = vtanh.f32 %v2155_v12  ;;  %v562_v16 = vsel %vm561_vm2, %v1443_v38, %v558_v13  ;;  %v2278_v38 = vld [vmem:[#allocation7 + $0xa0] sm:$0xff]  ;;  %2695 = vst [vmem:[#allocation19_spill] sm:$0xff] %v2296_v3  ;;  %v2323_v13 = vld [vmem:[#allocation7 + $0x58] sm:$0xff] }
 0x222   :  { %v567_v19 = vsel %vm564_vm3, %v566_v17, %v562_v16  ;;  %2689 = vst [vmem:[#allocation14_spill] sm:$0xff] %v2278_v38  ;;  %v2332_v16 = vld [vmem:[#allocation7 + $0x30] sm:$0xff]  ;;  %v2335_v17 = vld [vmem:[#allocation7 + $0x38] sm:$0xff] }
 0x223   :  { %2696 = vst [vmem:[#allocation35_spill] sm:$0xff] %v2299_v4 }
 0x224   :  { %2697 = vst [vmem:[#allocation20_spill] sm:$0xff] %v2302_v5 }
 0x225   :  { %2698 = vst [vmem:[#allocation21_spill] sm:$0xff] %v2305_v6 }
 0x226   :  { %2699 = vst [vmem:[#allocation22_spill] sm:$0xff] %v2308_v7 }
 0x227   :  { %v1447_v18 = vpop.eup %1446  ;;  %2700 = vst [vmem:[#allocation36_spill] sm:$0xff] %v2311_v8 }
 0x228   :  { %v573_v20 = vmul.f32 %v1447_v18, %v567_v19  ;;  %2701 = vst [vmem:[#allocation23_spill] sm:$0xff] %v2314_v9  ;;  %v2338_v18 = vld [vmem:[#allocation7] sm:$0xff]  ;;  %v2341_v19 = vld [vmem:[#allocation7 + $0x8] sm:$0xff] }
 0x229   :  { %2702 = vst [vmem:[#allocation24_spill] sm:$0xff] %v2317_v10 }
 0x22a   :  { %575 = vst [vmem:[#allocation9 + $0x10] sm:$0xff] %v573_v20  ;;  %597 = vmatmul.f32.vlgmr.msrb.gmra.mxu0 %v573_v20  ;;  %617 = vmatmul.f32.vlgmr.msrb.gmra.mxu1 %v573_v20 }
 0x22b   :  { %637 = vmatmul.f32.vlgmr.msrb.gmra.mxu2 %v573_v20  ;;  %657 = vmatmul.f32.vlgmr.msrb.gmra.mxu3 %v573_v20  ;;  %2703 = vst [vmem:[#allocation25_spill] sm:$0xff] %v2320_v11  ;;  %v2344_v20 = vld [vmem:[#allocation7 + $0x10] sm:$0xff] }
 0x22c   :  { %889 = vmatpush.msrb.mxu0 %v2158_v62  ;;  %909 = vmatpush.msrb.mxu1 %v2161_v21  ;;  %2704 = vst [vmem:[#allocation37_spill] sm:$0xff] %v2323_v13 }
 0x22d   :  { %929 = vmatpush.msrb.mxu2 %v2164_v22  ;;  %949 = vmatpush.msrb.mxu3 %v2167_v23  ;;  %2707 = vst [vmem:[#allocation29_spill] sm:$0xff] %v2332_v16 }
 0x22e   :  { %890 = vmatpush.msrb.mxu0 %v2170_v24  ;;  %910 = vmatpush.msrb.mxu1 %v2173_v25  ;;  %2708 = vst [vmem:[#allocation38_spill] sm:$0xff] %v2335_v17 }
 0x22f   :  { %930 = vmatpush.msrb.mxu2 %v2176_v26  ;;  %950 = vmatpush.msrb.mxu3 %v2179_v27  ;;  %2709 = vst [vmem:[#allocation30_spill] sm:$0xff] %v2338_v18 }
 0x230   :  { %891 = vmatpush.msrb.mxu0 %v2182_v28  ;;  %911 = vmatpush.msrb.mxu1 %v2185_v29  ;;  %2710 = vst [vmem:[#allocation32_spill] sm:$0xff] %v2341_v19 }
 0x231   :  { %931 = vmatpush.msrb.mxu2 %v2188_v30  ;;  %951 = vmatpush.msrb.mxu3 %v2191_v31  ;;  %2711 = vst [vmem:[#allocation33_spill] sm:$0xff] %v2344_v20 }
 0x232   :  { %892 = vmatpush.msrb.mxu0 %v2194_v32  ;;  %912 = vmatpush.msrb.mxu1 %v2197_v33 }
 0x233   :  { %932 = vmatpush.msrb.mxu2 %v2200_v35  ;;  %952 = vmatpush.msrb.mxu3 %v2203_v39 }
 0x234   :  { %893 = vmatpush.msrb.mxu0 %v2206_v43  ;;  %913 = vmatpush.msrb.mxu1 %v2209_v47 }
 0x235   :  { %933 = vmatpush.msrb.mxu2 %v2212_v60  ;;  %953 = vmatpush.msrb.mxu3 %v2215_v44 }
 0x236   :  { %894 = vmatpush.msrb.mxu0 %v2218_v34  ;;  %914 = vmatpush.msrb.mxu1 %v2221_v36 }
 0x237   :  { %934 = vmatpush.msrb.mxu2 %v2224_v37  ;;  %954 = vmatpush.msrb.mxu3 %v2227_v40 }
 0x238   :  { %895 = vmatpush.msrb.mxu0 %v2230_v49  ;;  %915 = vmatpush.msrb.mxu1 %v2233_v46 }
 0x239   :  { %935 = vmatpush.msrb.mxu2 %v2236_v55  ;;  %955 = vmatpush.msrb.mxu3 %v2239_v48 }
 0x23a   :  { %896 = vmatpush.msrb.mxu0 %v2242_v61  ;;  %916 = vmatpush.msrb.mxu1 %v2245_v54 }
 0x23b   :  { %936 = vmatpush.msrb.mxu2 %v2248_v50  ;;  %956 = vmatpush.msrb.mxu3 %v2251_v42 }
 0x23c   :  { %897 = vmatpush.msrb.mxu0 %v2254_v52  ;;  %917 = vmatpush.msrb.mxu1 %v2257_v63 }
 0x23d   :  { %937 = vmatpush.msrb.mxu2 %v2260_v57  ;;  %957 = vmatpush.msrb.mxu3 %v2263_v0 }
 0x23e   :  { %898 = vmatpush.msrb.mxu0 %v2266_v41  ;;  %918 = vmatpush.msrb.mxu1 %v2269_v59 }
 0x23f   :  { %938 = vmatpush.msrb.mxu2 %v2272_v51  ;;  %958 = vmatpush.msrb.mxu3 %v2275_v56 }
 0x240   :  { %899 = vmatpush.msrb.mxu0 %v2278_v38  ;;  %919 = vmatpush.msrb.mxu1 %v2281_v45 }
 0x241   :  { %939 = vmatpush.msrb.mxu2 %v2284_v53  ;;  %959 = vmatpush.msrb.mxu3 %v2287_v58 }
 0x242   :  { %900 = vmatpush.msrb.mxu0 %v2290_v1  ;;  %920 = vmatpush.msrb.mxu1 %v2293_v2 }
 0x243   :  { %940 = vmatpush.msrb.mxu2 %v2296_v3  ;;  %960 = vmatpush.msrb.mxu3 %v2299_v4 }
 0x244   :  { %901 = vmatpush.msrb.mxu0 %v2302_v5  ;;  %921 = vmatpush.msrb.mxu1 %v2305_v6 }
 0x245   :  { %941 = vmatpush.msrb.mxu2 %v2308_v7  ;;  %961 = vmatpush.msrb.mxu3 %v2311_v8  ;;  %v580_v8 = vld [vmem:[#allocation4 + $0x78] sm:$0xff] }
 0x246   :  { %902 = vmatpush.msrb.mxu0 %v2314_v9  ;;  %922 = vmatpush.msrb.mxu1 %v2317_v10 }
 0x247   :  { %942 = vmatpush.msrb.mxu2 %v2320_v11  ;;  %962 = vmatpush.msrb.mxu3 %v2323_v13 }
 0x248   :  { %903 = vmatpush.msrb.mxu0 %v2326_v14  ;;  %923 = vmatpush.msrb.mxu1 %v2329_v15  ;;  %v2347_v15 = vld [vmem:[#allocation7 + $0x18] sm:$0xff]  ;;  %v578_v14 = vld [vmem:[#allocation4 + $0x68] sm:$0xff] }
 0x249   :  { %943 = vmatpush.msrb.mxu2 %v2332_v16  ;;  %963 = vmatpush.msrb.mxu3 %v2335_v17  ;;  %2712 = vst [vmem:[#allocation39_spill] sm:$0xff] %v2347_v15  ;;  %v577_v16 = vld [vmem:[#allocation4 + $0x60] sm:$0xff] }
 0x24a   :  { %904 = vmatpush.msrb.mxu0 %v2338_v18  ;;  %924 = vmatpush.msrb.mxu1 %v2341_v19 }
 0x24b   :  { %944 = vmatpush.msrb.mxu2 %v2344_v20  ;;  %964 = vmatpush.msrb.mxu3 %v2347_v15  ;;  %v579_v15 = vld [vmem:[#allocation4 + $0x70] sm:$0xff] }
 0x2a7   :  { %v598_v13 = vpop.f32.mrf.mxu0  ;;  %v618_v17 = vpop.f32.mrf.mxu1 }
 0x2a8   :  { %v661_v11 = vadd.f32 %v598_v13, %v577_v16  ;;  %v662_v10 = vadd.f32 %v618_v17, %v578_v14 }
 0x2aa   :  { %v1377_v9 = vmul.f32 -1.442695, %v661_v11  ;;  %v1378_v18 = vmul.f32 -1.442695, %v662_v10 }
 0x2ac   :  { %1448 = vpow2.f32 %v1377_v9 }
 0x2ad   :  { %1450 = vpow2.f32 %v1378_v18 }
 0x2ae   :  { %v658_v19 = vpop.f32.mrf.mxu3  ;;  %v638_v2 = vpop.f32.mrf.mxu2 }
 0x2af   :  { %v664_v7 = vadd.f32 %v658_v19, %v580_v8  ;;  %v663_v11 = vadd.f32 %v638_v2, %v579_v15 }
 0x2b1   :  { %v1379_v6 = vmul.f32 -1.442695, %v664_v7 }
 0x2b2   :  { %v1449_v5 = vpop.eup %1448 }
 0x2b3   :  { %v1451_v20 = vpop.eup %1450  ;;  %v668_v4 = vadd.f32 1.0, %v1449_v5  ;;  %1452 = vpow2.f32 %v1379_v6 }
 0x2b4   :  { %v687_v3 = vadd.f32 1.0, %v1451_v20 }
 0x2b5   :  { %1454 = vrcp.f32 %v668_v4  ;;  %v680_v7 = vand.u32 2147483648, %v668_v4  ;;  %v678_v6 = vand.u32 2147483647, %v668_v4  ;;  %vm674_vm6 = vweird.f32 %v668_v4 }
 0x2b6   :  { %1456 = vrcp.f32 %v687_v3  ;;  %v699_v18 = vand.u32 2147483648, %v687_v3  ;;  %v697_v20 = vand.u32 2147483647, %v687_v3  ;;  %vm693_vm7 = vweird.f32 %v687_v3 }
 0x2b7   :  { %vm679_vm10 = vcmp.eq.f32.partialorder %v678_v6, 8.507059e+37 }
 0x2b8   :  { %vm698_vm11 = vcmp.eq.f32.partialorder %v697_v20, 8.507059e+37  ;;  %v2720_v20 = vld [vmem:[#allocation18_spill] sm:$0xff] }
 0x2b9   :  { %v1453_v1 = vpop.eup %1452 }
 0x2ba   :  { %v707_v13 = vadd.f32 1.0, %v1453_v1  ;;  %v681_v1 = vor.u32 1.1754944e-38, %v680_v7 }
 0x2bb   :  { %v1455_v14 = vpop.eup %1454 }
 0x2bc   :  { %v1457_v10 = vpop.eup %1456  ;;  %v670_v9 = vmul.f32 %v1455_v14, %v668_v4  ;;  %1458 = vrcp.f32 %v707_v13  ;;  %vm675_vm4 = vweird.f32 %v1455_v14  ;;  %v719_v7 = vand.u32 2147483648, %v707_v13 }
 0x2bd   :  { %v689_v16 = vmul.f32 %v1457_v10, %v687_v3  ;;  %1460 = vtanh.f32 %v663_v11  ;;  %vm694_vm5 = vweird.f32 %v1457_v10  ;;  %vm676_vm8 = vmor %vm674_vm6, %vm675_vm4  ;;  %vm713_vm13 = vweird.f32 %v707_v13 }
 0x2be   :  { %v671_v17 = vsub.f32 1.0, %v670_v9  ;;  %vm695_vm9 = vmor %vm693_vm7, %vm694_vm5  ;;  %v700_v9 = vor.u32 1.1754944e-38, %v699_v18  ;;  %v720_v18 = vor.u32 1.1754944e-38, %v719_v7  ;;  %v2731_v7 = vld [vmem:[#allocation26_spill] sm:$0xff] }
 0x2bf   :  { %v690_v8 = vsub.f32 1.0, %v689_v16 }
 0x2c0   :  { %v672_v5 = vmul.f32 %v1455_v14, %v671_v17 }
 0x2c1   :  { %v691_v19 = vmul.f32 %v1457_v10, %v690_v8 }
 0x2c2   :  { %v1459_v58 = vpop.eup %1458  ;;  %v673_v53 = vadd.f32 %v1455_v14, %v672_v5 }
 0x2c3   :  { %v692_v2 = vadd.f32 %v1457_v10, %v691_v19  ;;  %v709_v15 = vmul.f32 %v1459_v58, %v707_v13  ;;  %v1461_v11 = vpop.eup %1460  ;;  %vm714_vm12 = vweird.f32 %v1459_v58 }
 0x2c4   :  { %v677_v16 = vsel %vm676_vm8, %v1455_v14, %v673_v53  ;;  %v717_v53 = vand.u32 2147483647, %v707_v13  ;;  %vm715_vm14 = vmor %vm713_vm13, %vm714_vm12  ;;  %v2719_v13 = vld [vmem:[#allocation17_spill] sm:$0xff] }
 0x2c5   :  { %v682_v45 = vsel %vm679_vm10, %v681_v1, %v677_v16  ;;  %v696_v17 = vsel %vm695_vm9, %v1457_v10, %v692_v2  ;;  %v710_v38 = vsub.f32 1.0, %v709_v15  ;;  %v2721_v1 = vld [vmem:[#allocation19_spill] sm:$0xff]  ;;  %v2723_v15 = vld [vmem:[#allocation20_spill] sm:$0xff]  ;;  %v2725_v16 = vld [vmem:[#allocation22_spill] sm:$0xff] }
 0x2c6   :  { %v701_v8 = vsel %vm698_vm11, %v700_v9, %v696_v17  ;;  %v724_v56 = vmul.f32 %v1461_v11, %v682_v45  ;;  %vm718_vm15 = vcmp.eq.f32.partialorder %v717_v53, 8.507059e+37  ;;  %v2717_v45 = vld [vmem:[#allocation16_spill] sm:$0xff]  ;;  %v2722_v2 = vld [vmem:[#allocation35_spill] sm:$0xff]  ;;  %v2724_v9 = vld [vmem:[#allocation21_spill] sm:$0xff] }
 0x2c7   :  { %v723_v51 = vmul.f32 %v701_v8, %v2155_v12  ;;  %v711_v5 = vmul.f32 %v1459_v58, %v710_v38  ;;  %v2713_v12 = vld [vmem:[#allocation13_spill] sm:$0xff]  ;;  %v2716_v38 = vld [vmem:[#allocation15_spill] sm:$0xff]  ;;  %v2726_v11 = vld [vmem:[#allocation36_spill] sm:$0xff] }
 0x2c8   :  { %v2727_v17 = vld [vmem:[#allocation23_spill] sm:$0xff]  ;;  %v2728_v8 = vld [vmem:[#allocation24_spill] sm:$0xff] }
 0x2c9   :  { %v2351_v4 = vadd.f32 %v724_v56, %v723_v51  ;;  %v712_v3 = vadd.f32 %v1459_v58, %v711_v5  ;;  %v2714_v51 = vld [vmem:[#allocation27_spill] sm:$0xff]  ;;  %v2715_v56 = vld [vmem:[#allocation14_spill] sm:$0xff]  ;;  %v2729_v5 = vld [vmem:[#allocation25_spill] sm:$0xff] }
 0x2ca   :  { %v2732_v53 = vld [vmem:[#allocation28_spill] sm:$0xff] }
 0x2cb   :  { %1462 = vtanh.f32 %v2351_v4  ;;  %v716_v14 = vsel %vm715_vm14, %v1459_v58, %v712_v3  ;;  %v2718_v58 = vld [vmem:[#allocation31_spill] sm:$0xff]  ;;  %v2730_v3 = vld [vmem:[#allocation37_spill] sm:$0xff] }
 0x2cc   :  { %v721_v6 = vsel %vm718_vm15, %v720_v18, %v716_v14  ;;  %v2733_v14 = vld [vmem:[#allocation29_spill] sm:$0xff]  ;;  %v2734_v18 = vld [vmem:[#allocation38_spill] sm:$0xff] }
 0x2d1   :  { %v1463_v10 = vpop.eup %1462 }
 0x2d2   :  { %v727_v19 = vmul.f32 %v1463_v10, %v721_v6  ;;  %v2735_v10 = vld [vmem:[#allocation30_spill] sm:$0xff]  ;;  %v2736_v6 = vld [vmem:[#allocation32_spill] sm:$0xff] }
 0x2d4   :  { %729 = vst [vmem:[#allocation9 + $0x18] sm:$0xff] %v727_v19  ;;  %751 = vmatmul.f32.vlgmr.msra.gmra.mxu0 %v727_v19  ;;  %771 = vmatmul.f32.vlgmr.msra.gmra.mxu1 %v727_v19 }
 0x2d5   :  { %791 = vmatmul.f32.vlgmr.msra.gmra.mxu2 %v727_v19  ;;  %811 = vmatmul.f32.vlgmr.msra.gmra.mxu3 %v727_v19  ;;  %v2737_v19 = vld [vmem:[#allocation33_spill] sm:$0xff] }
 0x2d6   :  { %1043 = vmatpush.msra.mxu0 %v2158_v62  ;;  %1063 = vmatpush.msra.mxu1 %v2161_v21 }
 0x2d7   :  { %1083 = vmatpush.msra.mxu2 %v2164_v22  ;;  %1103 = vmatpush.msra.mxu3 %v2167_v23 }
 0x2d8   :  { %1044 = vmatpush.msra.mxu0 %v2170_v24  ;;  %1064 = vmatpush.msra.mxu1 %v2173_v25 }
 0x2d9   :  { %1084 = vmatpush.msra.mxu2 %v2176_v26  ;;  %1104 = vmatpush.msra.mxu3 %v2179_v27 }
 0x2da   :  { %1045 = vmatpush.msra.mxu0 %v2182_v28  ;;  %1065 = vmatpush.msra.mxu1 %v2185_v29 }
 0x2db   :  { %1085 = vmatpush.msra.mxu2 %v2188_v30  ;;  %1105 = vmatpush.msra.mxu3 %v2191_v31 }
 0x2dc   :  { %1046 = vmatpush.msra.mxu0 %v2194_v32  ;;  %1066 = vmatpush.msra.mxu1 %v2197_v33 }
 0x2dd   :  { %1086 = vmatpush.msra.mxu2 %v2200_v35  ;;  %1106 = vmatpush.msra.mxu3 %v2203_v39 }
 0x2de   :  { %1047 = vmatpush.msra.mxu0 %v2206_v43  ;;  %1067 = vmatpush.msra.mxu1 %v2209_v47 }
 0x2df   :  { %1087 = vmatpush.msra.mxu2 %v2212_v60  ;;  %1107 = vmatpush.msra.mxu3 %v2215_v44 }
 0x2e0   :  { %1048 = vmatpush.msra.mxu0 %v2218_v34  ;;  %1068 = vmatpush.msra.mxu1 %v2221_v36 }
 0x2e1   :  { %1088 = vmatpush.msra.mxu2 %v2224_v37  ;;  %1108 = vmatpush.msra.mxu3 %v2227_v40 }
 0x2e2   :  { %1049 = vmatpush.msra.mxu0 %v2230_v49  ;;  %1069 = vmatpush.msra.mxu1 %v2233_v46 }
 0x2e3   :  { %1089 = vmatpush.msra.mxu2 %v2236_v55  ;;  %1109 = vmatpush.msra.mxu3 %v2239_v48 }
 0x2e4   :  { %1050 = vmatpush.msra.mxu0 %v2242_v61  ;;  %1070 = vmatpush.msra.mxu1 %v2245_v54 }
 0x2e5   :  { %1090 = vmatpush.msra.mxu2 %v2248_v50  ;;  %1110 = vmatpush.msra.mxu3 %v2251_v42 }
 0x2e6   :  { %1051 = vmatpush.msra.mxu0 %v2254_v52  ;;  %1071 = vmatpush.msra.mxu1 %v2257_v63 }
 0x2e7   :  { %1091 = vmatpush.msra.mxu2 %v2260_v57  ;;  %1111 = vmatpush.msra.mxu3 %v2263_v0 }
 0x2e8   :  { %1052 = vmatpush.msra.mxu0 %v2266_v41  ;;  %1072 = vmatpush.msra.mxu1 %v2269_v59 }
 0x2e9   :  { %1092 = vmatpush.msra.mxu2 %v2713_v12  ;;  %1112 = vmatpush.msra.mxu3 %v2714_v51 }
 0x2ea   :  { %1053 = vmatpush.msra.mxu0 %v2715_v56  ;;  %1073 = vmatpush.msra.mxu1 %v2716_v38 }
 0x2eb   :  { %1093 = vmatpush.msra.mxu2 %v2717_v45  ;;  %1113 = vmatpush.msra.mxu3 %v2718_v58 }
 0x2ec   :  { %1054 = vmatpush.msra.mxu0 %v2719_v13  ;;  %1074 = vmatpush.msra.mxu1 %v2720_v20 }
 0x2ed   :  { %1094 = vmatpush.msra.mxu2 %v2721_v1  ;;  %1114 = vmatpush.msra.mxu3 %v2722_v2 }
 0x2ee   :  { %1055 = vmatpush.msra.mxu0 %v2723_v15  ;;  %1075 = vmatpush.msra.mxu1 %v2724_v9 }
 0x2ef   :  { %1095 = vmatpush.msra.mxu2 %v2725_v16  ;;  %1115 = vmatpush.msra.mxu3 %v2726_v11 }
 0x2f0   :  { %1056 = vmatpush.msra.mxu0 %v2727_v17  ;;  %1076 = vmatpush.msra.mxu1 %v2728_v8  ;;  %v2738_v17 = vld [vmem:[#allocation39_spill] sm:$0xff]  ;;  %v731_v8 = vld [vmem:[#allocation4 + $0x80] sm:$0xff] }
 0x2f1   :  { %1096 = vmatpush.msra.mxu2 %v2729_v5  ;;  %1116 = vmatpush.msra.mxu3 %v2730_v3  ;;  %v732_v5 = vld [vmem:[#allocation4 + $0x88] sm:$0xff] }
 0x2f2   :  { %1057 = vmatpush.msra.mxu0 %v2731_v7  ;;  %1077 = vmatpush.msra.mxu1 %v2732_v53 }
 0x2f3   :  { %1097 = vmatpush.msra.mxu2 %v2733_v14  ;;  %1117 = vmatpush.msra.mxu3 %v2734_v18  ;;  %v734_v14 = vld [vmem:[#allocation4 + $0x98] sm:$0xff] }
 0x2f4   :  { %1058 = vmatpush.msra.mxu0 %v2735_v10  ;;  %1078 = vmatpush.msra.mxu1 %v2736_v6 }
 0x2f5   :  { %1098 = vmatpush.msra.mxu2 %v2737_v19  ;;  %1118 = vmatpush.msra.mxu3 %v2738_v17  ;;  %v733_v17 = vld [vmem:[#allocation4 + $0x90] sm:$0xff] }
 0x351   :  { %v752_v11 = vpop.f32.mrf.mxu0  ;;  %v772_v3 = vpop.f32.mrf.mxu1 }
 0x352   :  { %v815_v16 = vadd.f32 %v752_v11, %v731_v8  ;;  %v816_v7 = vadd.f32 %v772_v3, %v732_v5 }
 0x354   :  { %v1380_v9 = vmul.f32 -1.442695, %v815_v16  ;;  %v1381_v53 = vmul.f32 -1.442695, %v816_v7 }
 0x356   :  { %1464 = vpow2.f32 %v1380_v9 }
 0x357   :  { %1466 = vpow2.f32 %v1381_v53 }
 0x358   :  { %v812_v18 = vpop.f32.mrf.mxu3  ;;  %v792_v20 = vpop.f32.mrf.mxu2 }
 0x359   :  { %v818_v15 = vadd.f32 %v812_v18, %v734_v14  ;;  %v817_v16 = vadd.f32 %v792_v20, %v733_v17 }
 0x35b   :  { %v1382_v10 = vmul.f32 -1.442695, %v818_v15 }
 0x35c   :  { %v1465_v2 = vpop.eup %1464 }
 0x35d   :  { %v1467_v6 = vpop.eup %1466  ;;  %v822_v1 = vadd.f32 1.0, %v1465_v2  ;;  %1468 = vpow2.f32 %v1382_v10 }
 0x35e   :  { %v841_v19 = vadd.f32 1.0, %v1467_v6 }
 0x35f   :  { %1470 = vrcp.f32 %v822_v1  ;;  %v834_v15 = vand.u32 2147483648, %v822_v1  ;;  %v832_v18 = vand.u32 2147483647, %v822_v1  ;;  %vm828_vm2 = vweird.f32 %v822_v1 }
 0x360   :  { %1472 = vrcp.f32 %v841_v19  ;;  %v853_v14 = vand.u32 2147483648, %v841_v19  ;;  %v851_v6 = vand.u32 2147483647, %v841_v19  ;;  %vm847_vm3 = vweird.f32 %v841_v19 }
 0x361   :  { %vm833_vm6 = vcmp.eq.f32.partialorder %v832_v18, 8.507059e+37 }
 0x362   :  { %vm852_vm7 = vcmp.eq.f32.partialorder %v851_v6, 8.507059e+37 }
 0x363   :  { %v1469_v13 = vpop.eup %1468 }
 0x364   :  { %v861_v11 = vadd.f32 1.0, %v1469_v13  ;;  %v835_v13 = vor.u32 1.1754944e-38, %v834_v15 }
 0x365   :  { %v1471_v8 = vpop.eup %1470 }
 0x366   :  { %v1473_v5 = vpop.eup %1472  ;;  %v824_v9 = vmul.f32 %v1471_v8, %v822_v1  ;;  %1474 = vrcp.f32 %v861_v11  ;;  %vm829_vm0 = vweird.f32 %v1471_v8  ;;  %v873_v15 = vand.u32 2147483648, %v861_v11 }
 0x367   :  { %v843_v3 = vmul.f32 %v1473_v5, %v841_v19  ;;  %1476 = vtanh.f32 %v817_v16  ;;  %vm848_vm1 = vweird.f32 %v1473_v5  ;;  %vm830_vm4 = vmor %vm828_vm2, %vm829_vm0  ;;  %vm867_vm9 = vweird.f32 %v861_v11 }
 0x368   :  { %v825_v7 = vsub.f32 1.0, %v824_v9  ;;  %vm849_vm5 = vmor %vm847_vm3, %vm848_vm1  ;;  %v854_v9 = vor.u32 1.1754944e-38, %v853_v14  ;;  %v874_v14 = vor.u32 1.1754944e-38, %v873_v15 }
 0x369   :  { %v844_v53 = vsub.f32 1.0, %v843_v3 }
 0x36a   :  { %v826_v2 = vmul.f32 %v1471_v8, %v825_v7 }
 0x36b   :  { %v845_v10 = vmul.f32 %v1473_v5, %v844_v53 }
 0x36c   :  { %v1475_v58 = vpop.eup %1474  ;;  %v827_v45 = vadd.f32 %v1471_v8, %v826_v2 }
 0x36d   :  { %v846_v20 = vadd.f32 %v1473_v5, %v845_v10  ;;  %v863_v17 = vmul.f32 %v1475_v58, %v861_v11  ;;  %v1477_v16 = vpop.eup %1476  ;;  %vm868_vm8 = vweird.f32 %v1475_v58 }
 0x36e   :  { %v831_v3 = vsel %vm830_vm4, %v1471_v8, %v827_v45  ;;  %v871_v45 = vand.u32 2147483647, %v861_v11  ;;  %vm869_vm10 = vmor %vm867_vm9, %vm868_vm8 }
 0x36f   :  { %v836_v38 = vsel %vm833_vm6, %v835_v13, %v831_v3  ;;  %v850_v7 = vsel %vm849_vm5, %v1473_v5, %v846_v20  ;;  %v864_v56 = vsub.f32 1.0, %v863_v17 }
 0x370   :  { %v855_v53 = vsel %vm852_vm7, %v854_v9, %v850_v7  ;;  %v878_v51 = vmul.f32 %v1477_v16, %v836_v38  ;;  %vm872_vm11 = vcmp.eq.f32.partialorder %v871_v45, 8.507059e+37  ;;  %v887_v38 = vld [vmem:[#allocation4 + $0xb0] sm:$0xff] }
 0x371   :  { %v877_v12 = vmul.f32 %v855_v53, %v2351_v4  ;;  %v865_v2 = vmul.f32 %v1475_v58, %v864_v56 }
 0x373   :  { %v2419_v1 = vadd.f32 %v878_v51, %v877_v12  ;;  %v866_v19 = vadd.f32 %v1475_v58, %v865_v2 }
 0x375   :  { %1478 = vtanh.f32 %v2419_v1  ;;  %v870_v8 = vsel %vm869_vm10, %v1475_v58, %v866_v19 }
 0x376   :  { %v875_v18 = vsel %vm872_vm11, %v874_v14, %v870_v8 }
 0x37b   :  { %v1479_v5 = vpop.eup %1478 }
 0x37c   :  { %v881_v10 = vmul.f32 %v1479_v5, %v875_v18 }
 0x37e   :  { %883 = vst [vmem:[#allocation9 + $0x20] sm:$0xff] %v881_v10  ;;  %905 = vmatmul.f32.vlgmr.msrb.gmra.mxu0 %v881_v10  ;;  %925 = vmatmul.f32.vlgmr.msrb.gmra.mxu1 %v881_v10 }
 0x37f   :  { %945 = vmatmul.f32.vlgmr.msrb.gmra.mxu2 %v881_v10  ;;  %965 = vmatmul.f32.vlgmr.msrb.gmra.mxu3 %v881_v10 }
 0x380   :  { %1197 = vmatpush.msrb.mxu0 %v2158_v62  ;;  %1217 = vmatpush.msrb.mxu1 %v2161_v21  ;;  %v2739_v62 = vld [vmem:[#allocation13_spill] sm:$0xff]  ;;  %v2740_v21 = vld [vmem:[#allocation27_spill] sm:$0xff] }
 0x381   :  { %1237 = vmatpush.msrb.mxu2 %v2164_v22  ;;  %1257 = vmatpush.msrb.mxu3 %v2167_v23  ;;  %v2741_v22 = vld [vmem:[#allocation14_spill] sm:$0xff]  ;;  %v2742_v23 = vld [vmem:[#allocation15_spill] sm:$0xff] }
 0x382   :  { %1198 = vmatpush.msrb.mxu0 %v2170_v24  ;;  %1218 = vmatpush.msrb.mxu1 %v2173_v25  ;;  %v2743_v24 = vld [vmem:[#allocation16_spill] sm:$0xff]  ;;  %v2744_v25 = vld [vmem:[#allocation31_spill] sm:$0xff] }
 0x383   :  { %1238 = vmatpush.msrb.mxu2 %v2176_v26  ;;  %1258 = vmatpush.msrb.mxu3 %v2179_v27  ;;  %v2745_v26 = vld [vmem:[#allocation17_spill] sm:$0xff]  ;;  %v2746_v27 = vld [vmem:[#allocation18_spill] sm:$0xff] }
 0x384   :  { %1199 = vmatpush.msrb.mxu0 %v2182_v28  ;;  %1219 = vmatpush.msrb.mxu1 %v2185_v29  ;;  %v2747_v28 = vld [vmem:[#allocation19_spill] sm:$0xff] }
 0x385   :  { %1239 = vmatpush.msrb.mxu2 %v2188_v30  ;;  %1259 = vmatpush.msrb.mxu3 %v2191_v31  ;;  %v2748_v29 = vld [vmem:[#allocation35_spill] sm:$0xff]  ;;  %v2749_v30 = vld [vmem:[#allocation20_spill] sm:$0xff]  ;;  %v2750_v31 = vld [vmem:[#allocation21_spill] sm:$0xff] }
 0x386   :  { %1200 = vmatpush.msrb.mxu0 %v2194_v32  ;;  %1220 = vmatpush.msrb.mxu1 %v2197_v33  ;;  %v2751_v32 = vld [vmem:[#allocation22_spill] sm:$0xff]  ;;  %v2752_v33 = vld [vmem:[#allocation36_spill] sm:$0xff] }
 0x387   :  { %1240 = vmatpush.msrb.mxu2 %v2200_v35  ;;  %1260 = vmatpush.msrb.mxu3 %v2203_v39  ;;  %v2753_v35 = vld [vmem:[#allocation23_spill] sm:$0xff]  ;;  %v2754_v39 = vld [vmem:[#allocation24_spill] sm:$0xff] }
 0x388   :  { %1201 = vmatpush.msrb.mxu0 %v2206_v43  ;;  %1221 = vmatpush.msrb.mxu1 %v2209_v47  ;;  %v2755_v43 = vld [vmem:[#allocation25_spill] sm:$0xff] }
 0x389   :  { %1241 = vmatpush.msrb.mxu2 %v2212_v60  ;;  %1261 = vmatpush.msrb.mxu3 %v2215_v44  ;;  %v2756_v47 = vld [vmem:[#allocation37_spill] sm:$0xff]  ;;  %v2757_v60 = vld [vmem:[#allocation26_spill] sm:$0xff]  ;;  %v2758_v44 = vld [vmem:[#allocation28_spill] sm:$0xff] }
 0x38a   :  { %1202 = vmatpush.msrb.mxu0 %v2218_v34  ;;  %1222 = vmatpush.msrb.mxu1 %v2221_v36  ;;  %v2759_v34 = vld [vmem:[#allocation29_spill] sm:$0xff]  ;;  %v2760_v36 = vld [vmem:[#allocation38_spill] sm:$0xff] }
 0x38b   :  { %1242 = vmatpush.msrb.mxu2 %v2224_v37  ;;  %1262 = vmatpush.msrb.mxu3 %v2227_v40  ;;  %v2761_v37 = vld [vmem:[#allocation30_spill] sm:$0xff]  ;;  %v2762_v40 = vld [vmem:[#allocation32_spill] sm:$0xff] }
 0x38c   :  { %1203 = vmatpush.msrb.mxu0 %v2230_v49  ;;  %1223 = vmatpush.msrb.mxu1 %v2233_v46  ;;  %v2763_v49 = vld [vmem:[#allocation33_spill] sm:$0xff]  ;;  %v2764_v46 = vld [vmem:[#allocation39_spill] sm:$0xff] }
 0x38d   :  { %1243 = vmatpush.msrb.mxu2 %v2236_v55  ;;  %1263 = vmatpush.msrb.mxu3 %v2239_v48  ;;  %v885_v55 = vld [vmem:[#allocation4 + $0xa0] sm:$0xff]  ;;  %v886_v48 = vld [vmem:[#allocation4 + $0xa8] sm:$0xff] }
 0x38e   :  { %1204 = vmatpush.msrb.mxu0 %v2242_v61  ;;  %1224 = vmatpush.msrb.mxu1 %v2245_v54 }
 0x38f   :  { %1244 = vmatpush.msrb.mxu2 %v2248_v50  ;;  %1264 = vmatpush.msrb.mxu3 %v2251_v42 }
 0x390   :  { %1205 = vmatpush.msrb.mxu0 %v2254_v52  ;;  %1225 = vmatpush.msrb.mxu1 %v2257_v63 }
 0x391   :  { %1245 = vmatpush.msrb.mxu2 %v2260_v57  ;;  %1265 = vmatpush.msrb.mxu3 %v2263_v0  ;;  %v888_v57 = vld [vmem:[#allocation4 + $0xb8] sm:$0xff] }
 0x392   :  { %1206 = vmatpush.msrb.mxu0 %v2266_v41  ;;  %1226 = vmatpush.msrb.mxu1 %v2269_v59 }
 0x393   :  { %1246 = vmatpush.msrb.mxu2 %v2739_v62  ;;  %1266 = vmatpush.msrb.mxu3 %v2740_v21 }
 0x394   :  { %1207 = vmatpush.msrb.mxu0 %v2741_v22  ;;  %1227 = vmatpush.msrb.mxu1 %v2742_v23 }
 0x395   :  { %1247 = vmatpush.msrb.mxu2 %v2743_v24  ;;  %1267 = vmatpush.msrb.mxu3 %v2744_v25 }
 0x396   :  { %1208 = vmatpush.msrb.mxu0 %v2745_v26  ;;  %1228 = vmatpush.msrb.mxu1 %v2746_v27 }
 0x397   :  { %1248 = vmatpush.msrb.mxu2 %v2747_v28  ;;  %1268 = vmatpush.msrb.mxu3 %v2748_v29 }
 0x398   :  { %1209 = vmatpush.msrb.mxu0 %v2749_v30  ;;  %1229 = vmatpush.msrb.mxu1 %v2750_v31 }
 0x399   :  { %1249 = vmatpush.msrb.mxu2 %v2751_v32  ;;  %1269 = vmatpush.msrb.mxu3 %v2752_v33 }
 0x39a   :  { %1210 = vmatpush.msrb.mxu0 %v2753_v35  ;;  %1230 = vmatpush.msrb.mxu1 %v2754_v39 }
 0x39b   :  { %1250 = vmatpush.msrb.mxu2 %v2755_v43  ;;  %1270 = vmatpush.msrb.mxu3 %v2756_v47 }
 0x39c   :  { %1211 = vmatpush.msrb.mxu0 %v2757_v60  ;;  %1231 = vmatpush.msrb.mxu1 %v2758_v44 }
 0x39d   :  { %1251 = vmatpush.msrb.mxu2 %v2759_v34  ;;  %1271 = vmatpush.msrb.mxu3 %v2760_v36  ;;  %v1040_v34 = vld [vmem:[#allocation4 + $0xc8] sm:$0xff] }
 0x39e   :  { %1212 = vmatpush.msrb.mxu0 %v2761_v37  ;;  %1232 = vmatpush.msrb.mxu1 %v2762_v40 }
 0x39f   :  { %1252 = vmatpush.msrb.mxu2 %v2763_v49  ;;  %1272 = vmatpush.msrb.mxu3 %v2764_v46 }
 0x3fb   :  { %v906_v61 = vpop.f32.mrf.mxu0  ;;  %v926_v54 = vpop.f32.mrf.mxu1 }
 0x3fc   :  { %v969_v50 = vadd.f32 %v906_v61, %v885_v55  ;;  %v970_v42 = vadd.f32 %v926_v54, %v886_v48  ;;  %v1042_v48 = vld [vmem:[#allocation4 + $0xd8] sm:$0xff] }
 0x3fe   :  { %v1383_v52 = vmul.f32 -1.442695, %v969_v50  ;;  %v1384_v63 = vmul.f32 -1.442695, %v970_v42 }
 0x400   :  { %1480 = vpow2.f32 %v1383_v52 }
 0x401   :  { %1482 = vpow2.f32 %v1384_v63 }
 0x402   :  { %v966_v0 = vpop.f32.mrf.mxu3  ;;  %v946_v58 = vpop.f32.mrf.mxu2 }
 0x403   :  { %v972_v41 = vadd.f32 %v966_v0, %v888_v57  ;;  %v971_v20 = vadd.f32 %v946_v58, %v887_v38  ;;  %v1041_v0 = vld [vmem:[#allocation4 + $0xd0] sm:$0xff] }
 0x405   :  { %v1385_v59 = vmul.f32 -1.442695, %v972_v41 }
 0x406   :  { %v1481_v4 = vpop.eup %1480 }
 0x407   :  { %v1483_v12 = vpop.eup %1482  ;;  %v976_v51 = vadd.f32 1.0, %v1481_v4  ;;  %1484 = vpow2.f32 %v1385_v59 }
 0x408   :  { %v995_v56 = vadd.f32 1.0, %v1483_v12 }
 0x409   :  { %1486 = vrcp.f32 %v976_v51  ;;  %v988_v53 = vand.u32 2147483648, %v976_v51  ;;  %v986_v15 = vand.u32 2147483647, %v976_v51  ;;  %vm982_vm14 = vweird.f32 %v976_v51 }
 0x40a   :  { %1488 = vrcp.f32 %v995_v56  ;;  %v1007_v2 = vand.u32 2147483648, %v995_v56  ;;  %v1005_v8 = vand.u32 2147483647, %v995_v56  ;;  %vm1001_vm15 = vweird.f32 %v995_v56 }
 0x40b   :  { %v989_v18 = vor.u32 1.1754944e-38, %v988_v53  ;;  %vm987_vm2 = vcmp.eq.f32.partialorder %v986_v15, 8.507059e+37 }
 0x40c   :  { %v1008_v21 = vor.u32 1.1754944e-38, %v1007_v2  ;;  %vm1006_vm3 = vcmp.eq.f32.partialorder %v1005_v8, 8.507059e+37 }
 0x40d   :  { %v1485_v11 = vpop.eup %1484 }
 0x40e   :  { %v1015_v6 = vadd.f32 1.0, %v1485_v11 }
 0x40f   :  { %v1487_v13 = vpop.eup %1486 }
 0x410   :  { %v1489_v17 = vpop.eup %1488  ;;  %v978_v9 = vmul.f32 %v1487_v13, %v976_v51  ;;  %1490 = vrcp.f32 %v1015_v6  ;;  %vm983_vm12 = vweird.f32 %v1487_v13  ;;  %v1027_v33 = vand.u32 2147483648, %v1015_v6 }
 0x411   :  { %v997_v3 = vmul.f32 %v1489_v17, %v995_v56  ;;  %1492 = vtanh.f32 %v971_v20  ;;  %vm1002_vm13 = vweird.f32 %v1489_v17  ;;  %vm984_vm0 = vmor %vm982_vm14, %vm983_vm12  ;;  %vm1021_vm5 = vweird.f32 %v1015_v6 }
 0x412   :  { %v979_v16 = vsub.f32 1.0, %v978_v9  ;;  %vm1003_vm1 = vmor %vm1001_vm15, %vm1002_vm13  ;;  %v1025_v35 = vand.u32 2147483647, %v1015_v6  ;;  %v1028_v43 = vor.u32 1.1754944e-38, %v1027_v33 }
 0x413   :  { %v998_v7 = vsub.f32 1.0, %v997_v3 }
 0x414   :  { %v980_v19 = vmul.f32 %v1487_v13, %v979_v16  ;;  %vm1026_vm7 = vcmp.eq.f32.partialorder %v1025_v35, 8.507059e+37  ;;  %v1194_v35 = vld [vmem:[#allocation4 + $0xe8] sm:$0xff] }
 0x415   :  { %v999_v45 = vmul.f32 %v1489_v17, %v998_v7 }
 0x416   :  { %v1491_v14 = vpop.eup %1490  ;;  %v981_v5 = vadd.f32 %v1487_v13, %v980_v19 }
 0x417   :  { %v1000_v10 = vadd.f32 %v1489_v17, %v999_v45  ;;  %v1017_v62 = vmul.f32 %v1491_v14, %v1015_v6  ;;  %v1493_v23 = vpop.eup %1492  ;;  %vm1022_vm4 = vweird.f32 %v1491_v14 }
 0x418   :  { %v985_v22 = vsel %vm984_vm0, %v1487_v13, %v981_v5  ;;  %vm1023_vm6 = vmor %vm1021_vm5, %vm1022_vm4 }
 0x419   :  { %v990_v24 = vsel %vm987_vm2, %v989_v18, %v985_v22  ;;  %v1004_v25 = vsel %vm1003_vm1, %v1489_v17, %v1000_v10  ;;  %v1018_v26 = vsub.f32 1.0, %v1017_v62 }
 0x41a   :  { %v1009_v27 = vsel %vm1006_vm3, %v1008_v21, %v1004_v25  ;;  %v1032_v28 = vmul.f32 %v1493_v23, %v990_v24 }
 0x41b   :  { %v1031_v29 = vmul.f32 %v1009_v27, %v2419_v1  ;;  %v1019_v30 = vmul.f32 %v1491_v14, %v1018_v26  ;;  %v1039_v1 = vld [vmem:[#allocation4 + $0xc0] sm:$0xff] }
 0x41d   :  { %v2487_v31 = vadd.f32 %v1032_v28, %v1031_v29  ;;  %v1020_v32 = vadd.f32 %v1491_v14, %v1019_v30 }
 0x41f   :  { %1494 = vtanh.f32 %v2487_v31  ;;  %v1024_v39 = vsel %vm1023_vm6, %v1491_v14, %v1020_v32 }
 0x420   :  { %v1029_v60 = vsel %vm1026_vm7, %v1028_v43, %v1024_v39 }
 0x425   :  { %v1495_v47 = vpop.eup %1494 }
 0x426   :  { %v1035_v44 = vmul.f32 %v1495_v47, %v1029_v60 }
 0x428   :  { %1037 = vst [vmem:[#allocation9 + $0x28] sm:$0xff] %v1035_v44  ;;  %1059 = vmatmul.f32.vlgmr.msra.gmra.mxu0 %v1035_v44  ;;  %1079 = vmatmul.f32.vlgmr.msra.gmra.mxu1 %v1035_v44 }
 0x429   :  { %1099 = vmatmul.f32.vlgmr.msra.gmra.mxu2 %v1035_v44  ;;  %1119 = vmatmul.f32.vlgmr.msra.gmra.mxu3 %v1035_v44 }
 0x4a5   :  { %v1060_v36 = vpop.f32.mrf.mxu0  ;;  %v1080_v37 = vpop.f32.mrf.mxu1 }
 0x4a6   :  { %v1123_v40 = vadd.f32 %v1060_v36, %v1039_v1  ;;  %v1124_v49 = vadd.f32 %v1080_v37, %v1040_v34  ;;  %v1196_v34 = vld [vmem:[#allocation4 + $0xf8] sm:$0xff] }
 0x4a8   :  { %v1386_v46 = vmul.f32 -1.442695, %v1123_v40  ;;  %v1387_v55 = vmul.f32 -1.442695, %v1124_v49 }
 0x4aa   :  { %1496 = vpow2.f32 %v1386_v46 }
 0x4ab   :  { %1498 = vpow2.f32 %v1387_v55 }
 0x4ac   :  { %v1120_v61 = vpop.f32.mrf.mxu3  ;;  %v1100_v41 = vpop.f32.mrf.mxu2 }
 0x4ad   :  { %v1126_v54 = vadd.f32 %v1120_v61, %v1042_v48  ;;  %v1125_v51 = vadd.f32 %v1100_v41, %v1041_v0  ;;  %v1195_v61 = vld [vmem:[#allocation4 + $0xf0] sm:$0xff] }
 0x4af   :  { %v1388_v50 = vmul.f32 -1.442695, %v1126_v54 }
 0x4b0   :  { %v1497_v42 = vpop.eup %1496 }
 0x4b1   :  { %v1499_v52 = vpop.eup %1498  ;;  %v1130_v63 = vadd.f32 1.0, %v1497_v42  ;;  %1500 = vpow2.f32 %v1388_v50 }
 0x4b2   :  { %v1149_v57 = vadd.f32 1.0, %v1499_v52 }
 0x4b3   :  { %1502 = vrcp.f32 %v1130_v63  ;;  %v1142_v13 = vand.u32 2147483648, %v1130_v63  ;;  %v1140_v9 = vand.u32 2147483647, %v1130_v63  ;;  %vm1136_vm10 = vweird.f32 %v1130_v63 }
 0x4b4   :  { %1504 = vrcp.f32 %v1149_v57  ;;  %v1161_v20 = vand.u32 2147483648, %v1149_v57  ;;  %v1159_v16 = vand.u32 2147483647, %v1149_v57  ;;  %vm1155_vm11 = vweird.f32 %v1149_v57 }
 0x4b5   :  { %v1143_v2 = vor.u32 1.1754944e-38, %v1142_v13  ;;  %vm1141_vm14 = vcmp.eq.f32.partialorder %v1140_v9, 8.507059e+37 }
 0x4b6   :  { %v1162_v45 = vor.u32 1.1754944e-38, %v1161_v20  ;;  %vm1160_vm15 = vcmp.eq.f32.partialorder %v1159_v16, 8.507059e+37 }
 0x4b7   :  { %v1501_v59 = vpop.eup %1500 }
 0x4b8   :  { %v1169_v4 = vadd.f32 1.0, %v1501_v59 }
 0x4b9   :  { %v1503_v12 = vpop.eup %1502 }
 0x4ba   :  { %v1505_v56 = vpop.eup %1504  ;;  %v1132_v38 = vmul.f32 %v1503_v12, %v1130_v63  ;;  %1506 = vrcp.f32 %v1169_v4  ;;  %vm1137_vm8 = vweird.f32 %v1503_v12  ;;  %v1181_v26 = vand.u32 2147483648, %v1169_v4 }
 0x4bb   :  { %v1151_v58 = vmul.f32 %v1505_v56, %v1149_v57  ;;  %1508 = vtanh.f32 %v1125_v51  ;;  %vm1156_vm9 = vweird.f32 %v1505_v56  ;;  %vm1138_vm12 = vmor %vm1136_vm10, %vm1137_vm8  ;;  %vm1175_vm1 = vweird.f32 %v1169_v4 }
 0x4bc   :  { %v1133_v11 = vsub.f32 1.0, %v1132_v38  ;;  %vm1157_vm13 = vmor %vm1155_vm11, %vm1156_vm9  ;;  %v1179_v27 = vand.u32 2147483647, %v1169_v4  ;;  %v1182_v29 = vor.u32 1.1754944e-38, %v1181_v26 }
 0x4bd   :  { %v1152_v6 = vsub.f32 1.0, %v1151_v58 }
 0x4be   :  { %v1134_v17 = vmul.f32 %v1503_v12, %v1133_v11  ;;  %vm1180_vm3 = vcmp.eq.f32.partialorder %v1179_v27, 8.507059e+37 }
 0x4bf   :  { %v1153_v3 = vmul.f32 %v1505_v56, %v1152_v6 }
 0x4c0   :  { %v1507_v7 = vpop.eup %1506  ;;  %v1135_v53 = vadd.f32 %v1503_v12, %v1134_v17 }
 0x4c1   :  { %v1154_v19 = vadd.f32 %v1505_v56, %v1153_v3  ;;  %v1171_v15 = vmul.f32 %v1507_v7, %v1169_v4  ;;  %v1509_v14 = vpop.eup %1508  ;;  %vm1176_vm0 = vweird.f32 %v1507_v7 }
 0x4c2   :  { %v1139_v8 = vsel %vm1138_vm12, %v1503_v12, %v1135_v53  ;;  %vm1177_vm2 = vmor %vm1175_vm1, %vm1176_vm0 }
 0x4c3   :  { %v1144_v5 = vsel %vm1141_vm14, %v1143_v2, %v1139_v8  ;;  %v1158_v18 = vsel %vm1157_vm13, %v1505_v56, %v1154_v19  ;;  %v1172_v10 = vsub.f32 1.0, %v1171_v15 }
 0x4c4   :  { %v1163_v62 = vsel %vm1160_vm15, %v1162_v45, %v1158_v18  ;;  %v1186_v21 = vmul.f32 %v1509_v14, %v1144_v5 }
 0x4c5   :  { %v1185_v22 = vmul.f32 %v1163_v62, %v2487_v31  ;;  %v1173_v23 = vmul.f32 %v1507_v7, %v1172_v10  ;;  %v1193_v31 = vld [vmem:[#allocation4 + $0xe0] sm:$0xff] }
 0x4c7   :  { %v2491_v24 = vadd.f32 %v1186_v21, %v1185_v22  ;;  %v1174_v25 = vadd.f32 %v1507_v7, %v1173_v23 }
 0x4c9   :  { %1510 = vtanh.f32 %v2491_v24  ;;  %v1178_v28 = vsel %vm1177_vm2, %v1507_v7, %v1174_v25 }
 0x4ca   :  { %v1183_v32 = vsel %vm1180_vm3, %v1182_v29, %v1178_v28 }
 0x4cf   :  { %v1511_v30 = vpop.eup %1510 }
 0x4d0   :  { %v1189_v33 = vmul.f32 %v1511_v30, %v1183_v32 }
 0x4d2   :  { %1191 = vst [vmem:[#allocation9 + $0x30] sm:$0xff] %v1189_v33  ;;  %1213 = vmatmul.f32.vlgmr.msrb.gmra.mxu0 %v1189_v33  ;;  %1233 = vmatmul.f32.vlgmr.msrb.gmra.mxu1 %v1189_v33 }
 0x4d3   :  { %1253 = vmatmul.f32.vlgmr.msrb.gmra.mxu2 %v1189_v33  ;;  %1273 = vmatmul.f32.vlgmr.msrb.gmra.mxu3 %v1189_v33 }
 0x54f   :  { %v1214_v39 = vpop.f32.mrf.mxu0  ;;  %v1234_v43 = vpop.f32.mrf.mxu1 }
 0x550   :  { %v1277_v47 = vadd.f32 %v1214_v39, %v1193_v31  ;;  %v1278_v60 = vadd.f32 %v1234_v43, %v1194_v35 }
 0x552   :  { %v1389_v44 = vmul.f32 -1.442695, %v1277_v47  ;;  %v1390_v1 = vmul.f32 -1.442695, %v1278_v60 }
 0x554   :  { %1512 = vpow2.f32 %v1389_v44 }
 0x555   :  { %1514 = vpow2.f32 %v1390_v1 }
 0x556   :  { %v1274_v36 = vpop.f32.mrf.mxu3  ;;  %v1254_v54 = vpop.f32.mrf.mxu2 }
 0x557   :  { %v1280_v37 = vadd.f32 %v1274_v36, %v1196_v34  ;;  %v1279_v63 = vadd.f32 %v1254_v54, %v1195_v61 }
 0x559   :  { %v1391_v40 = vmul.f32 -1.442695, %v1280_v37 }
 0x55a   :  { %v1513_v49 = vpop.eup %1512 }
 0x55b   :  { %v1515_v46 = vpop.eup %1514  ;;  %v1284_v55 = vadd.f32 1.0, %v1513_v49  ;;  %1516 = vpow2.f32 %v1391_v40 }
 0x55c   :  { %v1303_v48 = vadd.f32 1.0, %v1515_v46 }
 0x55d   :  { %1518 = vrcp.f32 %v1284_v55  ;;  %v1296_v12 = vand.u32 2147483648, %v1284_v55  ;;  %v1294_v38 = vand.u32 2147483647, %v1284_v55  ;;  %vm1290_vm6 = vweird.f32 %v1284_v55 }
 0x55e   :  { %1520 = vrcp.f32 %v1303_v48  ;;  %v1315_v51 = vand.u32 2147483648, %v1303_v48  ;;  %v1313_v11 = vand.u32 2147483647, %v1303_v48  ;;  %vm1309_vm7 = vweird.f32 %v1303_v48 }
 0x55f   :  { %v1297_v20 = vor.u32 1.1754944e-38, %v1296_v12  ;;  %vm1295_vm10 = vcmp.eq.f32.partialorder %v1294_v38, 8.507059e+37 }
 0x560   :  { %v1316_v3 = vor.u32 1.1754944e-38, %v1315_v51  ;;  %vm1314_vm11 = vcmp.eq.f32.partialorder %v1313_v11, 8.507059e+37 }
 0x561   :  { %v1517_v50 = vpop.eup %1516 }
 0x562   :  { %v1323_v42 = vadd.f32 1.0, %v1517_v50 }
 0x563   :  { %v1519_v52 = vpop.eup %1518 }
 0x564   :  { %v1521_v57 = vpop.eup %1520  ;;  %v1286_v0 = vmul.f32 %v1519_v52, %v1284_v55  ;;  %1522 = vrcp.f32 %v1323_v42  ;;  %vm1291_vm4 = vweird.f32 %v1519_v52  ;;  %v1335_v10 = vand.u32 2147483648, %v1323_v42 }
 0x565   :  { %v1305_v41 = vmul.f32 %v1521_v57, %v1303_v48  ;;  %1524 = vtanh.f32 %v1279_v63  ;;  %vm1310_vm5 = vweird.f32 %v1521_v57  ;;  %vm1292_vm8 = vmor %vm1290_vm6, %vm1291_vm4  ;;  %vm1329_vm13 = vweird.f32 %v1323_v42 }
 0x566   :  { %v1287_v59 = vsub.f32 1.0, %v1286_v0  ;;  %vm1311_vm9 = vmor %vm1309_vm7, %vm1310_vm5  ;;  %v1333_v62 = vand.u32 2147483647, %v1323_v42  ;;  %v1336_v22 = vor.u32 1.1754944e-38, %v1335_v10 }
 0x567   :  { %v1306_v4 = vsub.f32 1.0, %v1305_v41 }
 0x568   :  { %v1288_v56 = vmul.f32 %v1519_v52, %v1287_v59  ;;  %vm1334_vm15 = vcmp.eq.f32.partialorder %v1333_v62, 8.507059e+37 }
 0x569   :  { %v1307_v58 = vmul.f32 %v1521_v57, %v1306_v4 }
 0x56a   :  { %v1523_v6 = vpop.eup %1522  ;;  %v1289_v13 = vadd.f32 %v1519_v52, %v1288_v56 }
 0x56b   :  { %v1308_v17 = vadd.f32 %v1521_v57, %v1307_v58  ;;  %v1325_v9 = vmul.f32 %v1523_v6, %v1323_v42  ;;  %v1525_v7 = vpop.eup %1524  ;;  %vm1330_vm12 = vweird.f32 %v1523_v6 }
 0x56c   :  { %v1293_v16 = vsel %vm1292_vm8, %v1519_v52, %v1289_v13  ;;  %vm1331_vm14 = vmor %vm1329_vm13, %vm1330_vm12 }
 0x56d   :  { %v1298_v53 = vsel %vm1295_vm10, %v1297_v20, %v1293_v16  ;;  %v1312_v2 = vsel %vm1311_vm9, %v1521_v57, %v1308_v17  ;;  %v1326_v19 = vsub.f32 1.0, %v1325_v9 }
 0x56e   :  { %v1317_v15 = vsel %vm1314_vm11, %v1316_v3, %v1312_v2  ;;  %v1340_v45 = vmul.f32 %v1525_v7, %v1298_v53 }
 0x56f   :  { %v1339_v8 = vmul.f32 %v1317_v15, %v2491_v24  ;;  %v1327_v14 = vmul.f32 %v1523_v6, %v1326_v19 }
 0x571   :  { %v1341_v5 = vadd.f32 %v1340_v45, %v1339_v8  ;;  %v1328_v18 = vadd.f32 %v1523_v6, %v1327_v14 }
 0x573   :  { %1526 = vtanh.f32 %v1341_v5  ;;  %v1332_v21 = vsel %vm1331_vm14, %v1523_v6, %v1328_v18 }
 0x574   :  { %v1337_v24 = vsel %vm1334_vm15, %v1336_v22, %v1332_v21 }
 0x579   :  { %v1527_v23 = vpop.eup %1526 }
 0x57a   :  { %v1343_v25 = vmul.f32 %v1527_v23, %v1337_v24 }
 0x57c   :  { %1345 = vst [vmem:[#allocation9 + $0x38] sm:$0xff] %v1343_v25 }
 0x57d   :  { %1360 = dma.vmem_to_hbm [thread:$0]  %s1353_s1, 1024, %s1355_s23, [#allocation6], %s1676_s24, %s1676_s24, %s1677_s25  }
 0x57e   :  { %1668 = dma.done.wait [#allocation6], 1024  }
 0x57f   :  { %1669 = vsyncadd [#allocation6], 4294966272 }
 0x580   :  { %1365 = vsyncpa [#allocation5], 1 }
 0x581   :  { %1366 = vsyncpa [#allocation8], 1 }
 0x582   :  { %1367 = vsyncpa [#allocation6], 1 }

</bundles_post_ra>
